<compile_context>
chip_gen: v7x
topology: tpu7x:2x2x1
jax: 0.10.0
libtpu: 0.0.40
codegen_flags: <defaults>
</compile_context>

<pallas_src>
import math

import jax
import jax.numpy as jnp
from jax.experimental import pallas as pl
from jax.experimental.pallas import tpu as pltpu


_LANE = 128
_SUBLANE = 8
_N_ARRAYS = {"linear": 2, "noisy": 5}


# ---------------------------------------------------------------------------
# Small helpers
# ---------------------------------------------------------------------------

def _round_up(v, m):
    return ((v + m - 1) // m) * m


def _pad2d(a, rows, cols):
    a = jnp.asarray(a, jnp.float32)
    pr, pc = rows - a.shape[0], cols - a.shape[1]
    if pr or pc:
        a = jnp.pad(a, ((0, pr), (0, pc)))
    return a


# ---------------------------------------------------------------------------
# Fused kernel builder
# ---------------------------------------------------------------------------

def _build_fused_kernel(body_kinds, head_kinds, dueling, batch, out_size):
    """Build a Pallas kernel computing the whole NN forward on VMEM-resident,
    pre-transposed / pre-padded weights.  Layers consume their refs in the
    order produced by prepare_nn()."""

    def _apply(h, kind, refs):
        if kind == "linear":
            w_ref, b_ref = refs
            return jnp.dot(h, w_ref[...],
                           preferred_element_type=jnp.float32) + b_ref[...]
        wmu_ref, wsig_ref, ein_ref, eout_ref, b_ref = refs
        # x @ (mu + sigma*(eps_in ⊗ eps_out)) = x@mu + ((x*eps_in)@sigma)*eps_out
        y = jnp.dot(h, wmu_ref[...], preferred_element_type=jnp.float32)
        ys = jnp.dot(h * ein_ref[...], wsig_ref[...],
                     preferred_element_type=jnp.float32)
        return y + ys * eout_ref[...] + b_ref[...]

    def kernel(*args):
        x_ref, o_ref = args[0], args[-1]
        layer_refs = args[1:-1]
        pos = 0

        def take(kind):
            nonlocal pos
            n = _N_ARRAYS[kind]
            refs = layer_refs[pos:pos + n]
            pos += n
            return refs

        h = x_ref[...].astype(jnp.float32)
        h = _apply(h, body_kinds[0], take(body_kinds[0]))
        for kind in body_kinds[1:]:
            h = jnp.tanh(h)
            h = _apply(h, kind, take(kind))

        if dueling:
            h = jnp.tanh(h)
            a1, a2, v1, v2 = head_kinds
            adv = _apply(h, a1, take(a1))
            adv = jnp.tanh(adv)
            adv = _apply(adv, a2, take(a2))
            val = _apply(h, v1, take(v1))
            val = jnp.tanh(val)
            val = _apply(val, v2, take(v2))
            # advantage.mean() in the PyTorch model is a GLOBAL mean over
            # (batch, out).  Mask the zero-padded action columns and the
            # padded batch rows (those rows carry tanh(bias) garbage).
            rows = jax.lax.broadcasted_iota(jnp.int32, adv.shape, 0)
            cols = jax.lax.broadcasted_iota(jnp.int32, adv.shape, 1)
            valid = (rows < batch) & (cols < out_size)
            adv_mean = jnp.sum(jnp.where(valid, adv, 0.0)) * (
                1.0 / float(batch * out_size))
            # value's padded output columns are exactly zero (zero-padded
            # weights/bias), so a lane sum recovers the real scalar per row.
            val_col = jnp.sum(val, axis=-1, keepdims=True)
            h = val_col + adv - adv_mean

        o_ref[...] = h.astype(o_ref.dtype)

    return kernel


# ---------------------------------------------------------------------------
# One-time parameter preparation (transpose + pad + fold bias noise)
# ---------------------------------------------------------------------------

def _layer_dims(p):
    w = p["weight_mu"] if p["type"] == "noisy" else p["weight"]
    out_f, in_f = w.shape
    return in_f, out_f


def _prep_layer(p, k_pad, n_pad, training):
    """(out,in) torch layout -> pre-transposed (in,out), zero-padded to
    lane-aligned tiles; noisy bias noise folded into one effective bias."""
    if p["type"] == "noisy" and training:
        b_eff = p["bias_mu"] + p["bias_sigma"] * p["bias_epsilon"]
        return "noisy", [
            _pad2d(p["weight_mu"].T, k_pad, n_pad),
            _pad2d(p["weight_sigma"].T, k_pad, n_pad),
            _pad2d(p["eps_in"].reshape(1, -1), 1, k_pad),
            _pad2d(p["eps_out"].reshape(1, -1), 1, n_pad),
            _pad2d(b_eff.reshape(1, -1), 1, n_pad)]
    if p["type"] == "noisy":
        w, b = p["weight_mu"], p["bias_mu"]
    else:
        w, b = p["weight"], p["bias"]
    return "linear", [_pad2d(w.T, k_pad, n_pad),
                      _pad2d(b.reshape(1, -1), 1, n_pad)]


def prepare_nn(params, *, training=True):
    """One-time prep so the fused kernel does zero per-forward layout work."""
    dueling = params["dueling"]
    layers = params["layers"]

    body_kinds, head_kinds, arrays = [], [], []
    in0 = _layer_dims(layers[0])[0]
    k0_pad = _round_up(in0, _LANE)

    k_pad, last_out = k0_pad, None
    for p in layers:
        _, out_f = _layer_dims(p)
        n_pad = _round_up(out_f, _LANE)
        kind, arrs = _prep_layer(p, k_pad, n_pad, training)
        body_kinds.append(kind)
        arrays += arrs
        k_pad, last_out = n_pad, out_f

    if dueling:
        hid_pad = k_pad
        for first, second in (("advantage1", "advantage2"),
                              ("value1", "value2")):
            p1, p2 = params[first], params[second]
            n1 = _round_up(_layer_dims(p1)[1], _LANE)
            n2 = _round_up(_layer_dims(p2)[1], _LANE)
            k1, a1 = _prep_layer(p1, hid_pad, n1, training)
            k2, a2 = _prep_layer(p2, n1, n2, training)
            head_kinds += [k1, k2]
            arrays += a1 + a2
        out_size = _layer_dims(params["advantage2"])[1]
        n_out_pad = _round_up(out_size, _LANE)
    else:
        out_size = last_out
        n_out_pad = k_pad

    return dict(dueling=dueling, body_kinds=tuple(body_kinds),
                head_kinds=tuple(head_kinds), arrays=arrays,
                in_size=in0, k0_pad=k0_pad,
                out_size=out_size, n_out_pad=n_out_pad)


# ---------------------------------------------------------------------------
# Forward (single pallas_call)
# ---------------------------------------------------------------------------

def nn_forward(x, prepared):
    B, in_size = x.shape
    assert in_size == prepared["in_size"]
    B_pad = _round_up(max(B, _SUBLANE), _SUBLANE)
    x_p = _pad2d(x, B_pad, prepared["k0_pad"])

    kernel = _build_fused_kernel(
        prepared["body_kinds"], prepared["head_kinds"],
        prepared["dueling"], B, prepared["out_size"])

    vmem = pl.BlockSpec(memory_space=pltpu.MemorySpace.VMEM)
    n_in = 1 + len(prepared["arrays"])
    out = pl.pallas_call(
        kernel,
        out_shape=jax.ShapeDtypeStruct((B_pad, prepared["n_out_pad"]),
                                       jnp.float32),
        in_specs=[vmem] * n_in,
        out_specs=vmem,
        compiler_params=pltpu.CompilerParams(
            vmem_limit_bytes=32 * 1024 * 1024),
    )(x_p, *prepared["arrays"])
    return out[:B, :prepared["out_size"]]


# ---------------------------------------------------------------------------
# Parameter construction mirroring nn.Linear / NoisyLinear init
# ---------------------------------------------------------------------------

def _scale_noise(key, size):
    v = jax.random.normal(key, (size,), dtype=jnp.float32)
    return jnp.sign(v) * jnp.sqrt(jnp.abs(v))


def make_linear_params(key, in_f, out_f):
    kw, kb = jax.random.split(key)
    bound = 1.0 / math.sqrt(in_f)
    return dict(
        type="linear",
        weight=jax.random.uniform(kw, (out_f, in_f), jnp.float32, -bound, bound),
        bias=jax.random.uniform(kb, (out_f,), jnp.float32, -bound, bound))


def make_noisy_linear_params(key, in_f, out_f, std_init=0.4):
    k_wmu, k_bmu, k_ein, k_eout, k_beps = jax.random.split(key, 5)
    mu_range = 1.0 / math.sqrt(in_f)
    return dict(
        type="noisy",
        weight_mu=jax.random.uniform(k_wmu, (out_f, in_f), jnp.float32,
                                     -mu_range, mu_range),
        weight_sigma=jnp.full((out_f, in_f), std_init / math.sqrt(in_f),
                              jnp.float32),
        bias_mu=jax.random.uniform(k_bmu, (out_f,), jnp.float32,
                                   -mu_range, mu_range),
        bias_sigma=jnp.full((out_f,), std_init / math.sqrt(out_f), jnp.float32),
        # Factorized noise: weight_epsilon = outer(eps_out, eps_in).
        eps_in=_scale_noise(k_ein, in_f),
        eps_out=_scale_noise(k_eout, out_f),
        bias_epsilon=_scale_noise(k_beps, out_f))


def make_nn_params(key, in_size, out_size, *, dueling=True, noisy=True,
                   hidden=200, head_hidden=100):
    keys = jax.random.split(key, 6)
    layers = [make_linear_params(keys[0], in_size, hidden)]
    if not dueling:
        mk2 = make_noisy_linear_params if noisy else make_linear_params
        layers.append(mk2(keys[1], hidden, out_size))
    mk = make_noisy_linear_params if noisy else make_linear_params
    return dict(dueling=dueling, noisy=noisy, layers=layers,
                advantage1=mk(keys[2], hidden, head_hidden),
                advantage2=mk(keys[3], head_hidden, out_size),
                value1=mk(keys[4], hidden, head_hidden),
                value2=mk(keys[5], head_hidden, 1))


# ---------------------------------------------------------------------------
# Pure-JAX reference (mirrors the PyTorch forward exactly)
# ---------------------------------------------------------------------------

def _ref_layer(x, p, training):
    if p["type"] == "noisy":
        if training:
            w_eps = jnp.outer(p["eps_out"], p["eps_in"])
            w = p["weight_mu"] + p["weight_sigma"] * w_eps
            b = p["bias_mu"] + p["bias_sigma"] * p["bias_epsilon"]
        else:
            w, b = p["weight_mu"], p["bias_mu"]
    else:
        w, b = p["weight"], p["bias"]
    return x @ w.T + b


def nn_forward_ref(x, params, *, training=True):
    layers = params["layers"]
    h = _ref_layer(x, layers[0], training)
    for lp in layers[1:]:
        h = jnp.tanh(h)
        h = _ref_layer(h, lp, training)
    if params["dueling"]:
        h = jnp.tanh(h)
        adv = _ref_layer(h, params["advantage1"], training)
        adv = jnp.tanh(adv)
        adv = _ref_layer(adv, params["advantage2"], training)
        val = _ref_layer(h, params["value1"], training)
        val = jnp.tanh(val)
        val = _ref_layer(val, params["value2"], training)
        h = val + adv - jnp.mean(adv)   # global mean, matching PyTorch .mean()
    return h


# ---------------------------------------------------------------------------
# Self-test
# ---------------------------------------------------------------------------

def _check(x, params, training, atol=1e-3):
    prepared = prepare_nn(params, training=training)
    y = jax.block_until_ready(nn_forward(x, prepared))
    y_ref = nn_forward_ref(x, params, training=training)
    assert y.shape == y_ref.shape, (y.shape, y_ref.shape)
    err = float(jnp.max(jnp.abs(y - y_ref)))
    assert jnp.allclose(y, y_ref, atol=atol, rtol=atol), err
    return y


if __name__ == "__main__":
    key = jax.random.PRNGKey(0)
    k_params, k_params2, k_x = jax.random.split(key, 3)

    batch, in_size, out_size = 4, 32, 6
    x = jax.random.normal(k_x, (batch, in_size), dtype=jnp.float32)

    # Dueling + noisy (the default config): training and eval paths.
    params = make_nn_params(k_params, in_size, out_size,
                            dueling=True, noisy=True)
    y = _check(x, params, training=True)
    assert y.shape == (batch, out_size)
    _check(x, params, training=False)

    # Non-dueling noisy config (2-layer body, no heads) for coverage.
    params_nd = make_nn_params(k_params2, in_size, out_size,
                               dueling=False, noisy=True)
    _check(x, params_nd, training=True)

    print("KERNEL_OK")
</pallas_src>

<mosaic_0001>
module attributes {stable_mosaic.version = 11 : i64} {
  func.func @kernel(%arg0: memref<8x128xf32, #tpu.memory_space<vmem>>, %arg1: memref<128x256xf32, #tpu.memory_space<vmem>>, %arg2: memref<1x256xf32, #tpu.memory_space<vmem>>, %arg3: memref<256x128xf32, #tpu.memory_space<vmem>>, %arg4: memref<256x128xf32, #tpu.memory_space<vmem>>, %arg5: memref<1x256xf32, #tpu.memory_space<vmem>>, %arg6: memref<1x128xf32, #tpu.memory_space<vmem>>, %arg7: memref<1x128xf32, #tpu.memory_space<vmem>>, %arg8: memref<128x128xf32, #tpu.memory_space<vmem>>, %arg9: memref<128x128xf32, #tpu.memory_space<vmem>>, %arg10: memref<1x128xf32, #tpu.memory_space<vmem>>, %arg11: memref<1x128xf32, #tpu.memory_space<vmem>>, %arg12: memref<1x128xf32, #tpu.memory_space<vmem>>, %arg13: memref<256x128xf32, #tpu.memory_space<vmem>>, %arg14: memref<256x128xf32, #tpu.memory_space<vmem>>, %arg15: memref<1x256xf32, #tpu.memory_space<vmem>>, %arg16: memref<1x128xf32, #tpu.memory_space<vmem>>, %arg17: memref<1x128xf32, #tpu.memory_space<vmem>>, %arg18: memref<128x128xf32, #tpu.memory_space<vmem>>, %arg19: memref<128x128xf32, #tpu.memory_space<vmem>>, %arg20: memref<1x128xf32, #tpu.memory_space<vmem>>, %arg21: memref<1x128xf32, #tpu.memory_space<vmem>>, %arg22: memref<1x128xf32, #tpu.memory_space<vmem>>, %arg23: memref<8x128xf32, #tpu.memory_space<vmem>>) attributes {dimension_semantics = [], scalar_prefetch = 0 : i64, scratch_operands = 0 : i64, tpu.core_type = #tpu.core_type<tc>} {
    %c0 = arith.constant 0 : index
    %c0_0 = arith.constant 0 : index
    %0 = vector.load %arg0[%c0, %c0_0] : memref<8x128xf32, #tpu.memory_space<vmem>>, vector<8x128xf32>
    %c0_1 = arith.constant 0 : index
    %c0_2 = arith.constant 0 : index
    %1 = vector.load %arg1[%c0_1, %c0_2] : memref<128x256xf32, #tpu.memory_space<vmem>>, vector<128x256xf32>
    %cst = arith.constant dense<0.000000e+00> : vector<8x256xf32>
    %2 = tpu.matmul %0, %1, %cst {dimension_numbers = #tpu.dot_dimension_numbers<[1], [0], [0], [1], [0, 0, 1, 1], [], []>} : vector<8x128xf32>, vector<128x256xf32>, vector<8x256xf32> -> vector<8x256xf32>
    %c0_3 = arith.constant 0 : index
    %c0_4 = arith.constant 0 : index
    %3 = vector.load %arg2[%c0_3, %c0_4] : memref<1x256xf32, #tpu.memory_space<vmem>>, vector<1x256xf32>
    %4 = vector.broadcast %3 : vector<1x256xf32> to vector<8x256xf32>
    %5 = arith.addf %2, %4 : vector<8x256xf32>
    %6 = math.tanh %5 : vector<8x256xf32>
    %c0_5 = arith.constant 0 : index
    %c0_6 = arith.constant 0 : index
    %7 = vector.load %arg3[%c0_5, %c0_6] : memref<256x128xf32, #tpu.memory_space<vmem>>, vector<256x128xf32>
    %cst_7 = arith.constant dense<0.000000e+00> : vector<8x128xf32>
    %8 = tpu.matmul %6, %7, %cst_7 {dimension_numbers = #tpu.dot_dimension_numbers<[1], [0], [0], [1], [0, 0, 1, 1], [], []>} : vector<8x256xf32>, vector<256x128xf32>, vector<8x128xf32> -> vector<8x128xf32>
    %c0_8 = arith.constant 0 : index
    %c0_9 = arith.constant 0 : index
    %9 = vector.load %arg5[%c0_8, %c0_9] : memref<1x256xf32, #tpu.memory_space<vmem>>, vector<1x256xf32>
    %10 = vector.broadcast %9 : vector<1x256xf32> to vector<8x256xf32>
    %11 = arith.mulf %6, %10 : vector<8x256xf32>
    %c0_10 = arith.constant 0 : index
    %c0_11 = arith.constant 0 : index
    %12 = vector.load %arg4[%c0_10, %c0_11] : memref<256x128xf32, #tpu.memory_space<vmem>>, vector<256x128xf32>
    %cst_12 = arith.constant dense<0.000000e+00> : vector<8x128xf32>
    %13 = tpu.matmul %11, %12, %cst_12 {dimension_numbers = #tpu.dot_dimension_numbers<[1], [0], [0], [1], [0, 0, 1, 1], [], []>} : vector<8x256xf32>, vector<256x128xf32>, vector<8x128xf32> -> vector<8x128xf32>
    %c0_13 = arith.constant 0 : index
    %c0_14 = arith.constant 0 : index
    %14 = vector.load %arg6[%c0_13, %c0_14] : memref<1x128xf32, #tpu.memory_space<vmem>>, vector<1x128xf32>
    %15 = vector.broadcast %14 : vector<1x128xf32> to vector<8x128xf32>
    %16 = arith.mulf %13, %15 : vector<8x128xf32>
    %17 = arith.addf %8, %16 : vector<8x128xf32>
    %c0_15 = arith.constant 0 : index
    %c0_16 = arith.constant 0 : index
    %18 = vector.load %arg7[%c0_15, %c0_16] : memref<1x128xf32, #tpu.memory_space<vmem>>, vector<1x128xf32>
    %19 = vector.broadcast %18 : vector<1x128xf32> to vector<8x128xf32>
    %20 = arith.addf %17, %19 : vector<8x128xf32>
    %21 = math.tanh %20 : vector<8x128xf32>
    %c0_17 = arith.constant 0 : index
    %c0_18 = arith.constant 0 : index
    %22 = vector.load %arg8[%c0_17, %c0_18] : memref<128x128xf32, #tpu.memory_space<vmem>>, vector<128x128xf32>
    %cst_19 = arith.constant dense<0.000000e+00> : vector<8x128xf32>
    %23 = tpu.matmul %21, %22, %cst_19 {dimension_numbers = #tpu.dot_dimension_numbers<[1], [0], [0], [1], [0, 0, 1, 1], [], []>} : vector<8x128xf32>, vector<128x128xf32>, vector<8x128xf32> -> vector<8x128xf32>
    %c0_20 = arith.constant 0 : index
    %c0_21 = arith.constant 0 : index
    %24 = vector.load %arg10[%c0_20, %c0_21] : memref<1x128xf32, #tpu.memory_space<vmem>>, vector<1x128xf32>
    %25 = vector.broadcast %24 : vector<1x128xf32> to vector<8x128xf32>
    %26 = arith.mulf %21, %25 : vector<8x128xf32>
    %c0_22 = arith.constant 0 : index
    %c0_23 = arith.constant 0 : index
    %27 = vector.load %arg9[%c0_22, %c0_23] : memref<128x128xf32, #tpu.memory_space<vmem>>, vector<128x128xf32>
    %cst_24 = arith.constant dense<0.000000e+00> : vector<8x128xf32>
    %28 = tpu.matmul %26, %27, %cst_24 {dimension_numbers = #tpu.dot_dimension_numbers<[1], [0], [0], [1], [0, 0, 1, 1], [], []>} : vector<8x128xf32>, vector<128x128xf32>, vector<8x128xf32> -> vector<8x128xf32>
    %c0_25 = arith.constant 0 : index
    %c0_26 = arith.constant 0 : index
    %29 = vector.load %arg11[%c0_25, %c0_26] : memref<1x128xf32, #tpu.memory_space<vmem>>, vector<1x128xf32>
    %30 = vector.broadcast %29 : vector<1x128xf32> to vector<8x128xf32>
    %31 = arith.mulf %28, %30 : vector<8x128xf32>
    %32 = arith.addf %23, %31 : vector<8x128xf32>
    %c0_27 = arith.constant 0 : index
    %c0_28 = arith.constant 0 : index
    %33 = vector.load %arg12[%c0_27, %c0_28] : memref<1x128xf32, #tpu.memory_space<vmem>>, vector<1x128xf32>
    %34 = vector.broadcast %33 : vector<1x128xf32> to vector<8x128xf32>
    %35 = arith.addf %32, %34 : vector<8x128xf32>
    %c0_29 = arith.constant 0 : index
    %c0_30 = arith.constant 0 : index
    %36 = vector.load %arg13[%c0_29, %c0_30] : memref<256x128xf32, #tpu.memory_space<vmem>>, vector<256x128xf32>
    %cst_31 = arith.constant dense<0.000000e+00> : vector<8x128xf32>
    %37 = tpu.matmul %6, %36, %cst_31 {dimension_numbers = #tpu.dot_dimension_numbers<[1], [0], [0], [1], [0, 0, 1, 1], [], []>} : vector<8x256xf32>, vector<256x128xf32>, vector<8x128xf32> -> vector<8x128xf32>
    %c0_32 = arith.constant 0 : index
    %c0_33 = arith.constant 0 : index
    %38 = vector.load %arg15[%c0_32, %c0_33] : memref<1x256xf32, #tpu.memory_space<vmem>>, vector<1x256xf32>
    %39 = vector.broadcast %38 : vector<1x256xf32> to vector<8x256xf32>
    %40 = arith.mulf %6, %39 : vector<8x256xf32>
    %c0_34 = arith.constant 0 : index
    %c0_35 = arith.constant 0 : index
    %41 = vector.load %arg14[%c0_34, %c0_35] : memref<256x128xf32, #tpu.memory_space<vmem>>, vector<256x128xf32>
    %cst_36 = arith.constant dense<0.000000e+00> : vector<8x128xf32>
    %42 = tpu.matmul %40, %41, %cst_36 {dimension_numbers = #tpu.dot_dimension_numbers<[1], [0], [0], [1], [0, 0, 1, 1], [], []>} : vector<8x256xf32>, vector<256x128xf32>, vector<8x128xf32> -> vector<8x128xf32>
    %c0_37 = arith.constant 0 : index
    %c0_38 = arith.constant 0 : index
    %43 = vector.load %arg16[%c0_37, %c0_38] : memref<1x128xf32, #tpu.memory_space<vmem>>, vector<1x128xf32>
    %44 = vector.broadcast %43 : vector<1x128xf32> to vector<8x128xf32>
    %45 = arith.mulf %42, %44 : vector<8x128xf32>
    %46 = arith.addf %37, %45 : vector<8x128xf32>
    %c0_39 = arith.constant 0 : index
    %c0_40 = arith.constant 0 : index
    %47 = vector.load %arg17[%c0_39, %c0_40] : memref<1x128xf32, #tpu.memory_space<vmem>>, vector<1x128xf32>
    %48 = vector.broadcast %47 : vector<1x128xf32> to vector<8x128xf32>
    %49 = arith.addf %46, %48 : vector<8x128xf32>
    %50 = math.tanh %49 : vector<8x128xf32>
    %c0_41 = arith.constant 0 : index
    %c0_42 = arith.constant 0 : index
    %51 = vector.load %arg18[%c0_41, %c0_42] : memref<128x128xf32, #tpu.memory_space<vmem>>, vector<128x128xf32>
    %cst_43 = arith.constant dense<0.000000e+00> : vector<8x128xf32>
    %52 = tpu.matmul %50, %51, %cst_43 {dimension_numbers = #tpu.dot_dimension_numbers<[1], [0], [0], [1], [0, 0, 1, 1], [], []>} : vector<8x128xf32>, vector<128x128xf32>, vector<8x128xf32> -> vector<8x128xf32>
    %c0_44 = arith.constant 0 : index
    %c0_45 = arith.constant 0 : index
    %53 = vector.load %arg20[%c0_44, %c0_45] : memref<1x128xf32, #tpu.memory_space<vmem>>, vector<1x128xf32>
    %54 = vector.broadcast %53 : vector<1x128xf32> to vector<8x128xf32>
    %55 = arith.mulf %50, %54 : vector<8x128xf32>
    %c0_46 = arith.constant 0 : index
    %c0_47 = arith.constant 0 : index
    %56 = vector.load %arg19[%c0_46, %c0_47] : memref<128x128xf32, #tpu.memory_space<vmem>>, vector<128x128xf32>
    %cst_48 = arith.constant dense<0.000000e+00> : vector<8x128xf32>
    %57 = tpu.matmul %55, %56, %cst_48 {dimension_numbers = #tpu.dot_dimension_numbers<[1], [0], [0], [1], [0, 0, 1, 1], [], []>} : vector<8x128xf32>, vector<128x128xf32>, vector<8x128xf32> -> vector<8x128xf32>
    %c0_49 = arith.constant 0 : index
    %c0_50 = arith.constant 0 : index
    %58 = vector.load %arg21[%c0_49, %c0_50] : memref<1x128xf32, #tpu.memory_space<vmem>>, vector<1x128xf32>
    %59 = vector.broadcast %58 : vector<1x128xf32> to vector<8x128xf32>
    %60 = arith.mulf %57, %59 : vector<8x128xf32>
    %61 = arith.addf %52, %60 : vector<8x128xf32>
    %c0_51 = arith.constant 0 : index
    %c0_52 = arith.constant 0 : index
    %62 = vector.load %arg22[%c0_51, %c0_52] : memref<1x128xf32, #tpu.memory_space<vmem>>, vector<1x128xf32>
    %63 = vector.broadcast %62 : vector<1x128xf32> to vector<8x128xf32>
    %64 = arith.addf %61, %63 : vector<8x128xf32>
    %65 = tpu.iota {dimensions = array<i32: 0>} : vector<8x128xi32>
    %66 = tpu.iota {dimensions = array<i32: 1>} : vector<8x128xi32>
    %c4_i32 = arith.constant 4 : i32
    %67 = vector.broadcast %c4_i32 : i32 to vector<8x128xi32>
    %68 = arith.cmpi slt, %65, %67 : vector<8x128xi32>
    %c6_i32 = arith.constant 6 : i32
    %69 = vector.broadcast %c6_i32 : i32 to vector<8x128xi32>
    %70 = arith.cmpi slt, %66, %69 : vector<8x128xi32>
    %71 = arith.andi %68, %70 : vector<8x128xi1>
    %cst_53 = arith.constant 0.000000e+00 : f32
    %72 = vector.broadcast %cst_53 : f32 to vector<8x128xf32>
    %73 = arith.select %71, %35, %72 : vector<8x128xi1>, vector<8x128xf32>
    %74 = vector.shape_cast %73 : vector<8x128xf32> to vector<1x8x128xf32>
    %cst_54 = arith.constant dense<0.000000e+00> : vector<1xf32>
    %75 = vector.multi_reduction <add>, %74, %cst_54 [1, 2] : vector<1x8x128xf32> to vector<1xf32>
    %76 = vector.shape_cast %75 : vector<1xf32> to vector<1x1x1xf32>
    %77 = vector.extract %76[0, 0, 0] : f32 from vector<1x1x1xf32>
    %cst_55 = arith.constant 0.0416666679 : f32
    %78 = arith.mulf %77, %cst_55 : f32
    %cst_56 = arith.constant dense<0.000000e+00> : vector<8xf32>
    %79 = vector.multi_reduction <add>, %64, %cst_56 [1] : vector<8x128xf32> to vector<8xf32>
    %80 = vector.shape_cast %79 : vector<8xf32> to vector<8x1xf32>
    %81 = vector.broadcast %80 : vector<8x1xf32> to vector<8x128xf32>
    %82 = arith.addf %81, %35 : vector<8x128xf32>
    %83 = vector.broadcast %78 : f32 to vector<8x128xf32>
    %84 = arith.subf %82, %83 : vector<8x128xf32>
    %c0_57 = arith.constant 0 : index
    %c0_58 = arith.constant 0 : index
    %85 = vector.load %arg23[%c0_57, %c0_58] : memref<8x128xf32, #tpu.memory_space<vmem>>, vector<8x128xf32>
    tpu.vector_store %arg23[%c0_57, %c0_58], %84 {strides = array<i32>} : memref<8x128xf32, #tpu.memory_space<vmem>>, vector<8x128xf32>,
    return
  }
}

</mosaic_0001>

<bundles_post_ra>
// kernel: tpu_custom_call.1
= control target key start
LH: loop header
LB: loop body
LE: loop exit
PB: predicated region body
PF: predicated region fallthrough
CT: control target
= control target key end

     0   :  { %s2538_s0 = inlined_call_operand.hbm [shape: f32[8,128], index: 0, kind: input, shape index: {}]   ;;  %s2539_s1 = inlined_call_operand.hbm [shape: f32[128,256], index: 1, kind: input, shape index: {}]   ;;  %s2540_s2 = inlined_call_operand.vmem [shape: f32[1,256], index: 2, kind: input, shape index: {}]   ;;  %s2541_s3 = inlined_call_operand.hbm [shape: f32[256,128], index: 3, kind: input, shape index: {}]   ;;  %s2542_s4 = inlined_call_operand.hbm [shape: f32[256,128], index: 4, kind: input, shape index: {}]   ;;  %s2543_s5 = inlined_call_operand.vmem [shape: f32[1,256], index: 5, kind: input, shape index: {}]   ;;  %s2544_s6 = inlined_call_operand.vmem [shape: f32[1,128], index: 6, kind: input, shape index: {}]   ;;  %s2545_s7 = inlined_call_operand.vmem [shape: f32[1,128], index: 7, kind: input, shape index: {}]   ;;  %s2546_s8 = inlined_call_operand.hbm [shape: f32[128,128], index: 8, kind: input, shape index: {}]   ;;  %s2547_s9 = inlined_call_operand.hbm [shape: f32[128,128], index: 9, kind: input, shape index: {}]   ;;  %s2548_s10 = inlined_call_operand.vmem [shape: f32[1,128], index: 10, kind: input, shape index: {}]   ;;  %s2549_s11 = inlined_call_operand.vmem [shape: f32[1,128], index: 11, kind: input, shape index: {}]   ;;  %s2550_s12 = inlined_call_operand.vmem [shape: f32[1,128], index: 12, kind: input, shape index: {}]   ;;  %s2551_s13 = inlined_call_operand.hbm [shape: f32[256,128], index: 13, kind: input, shape index: {}]   ;;  %s2552_s14 = inlined_call_operand.hbm [shape: f32[256,128], index: 14, kind: input, shape index: {}]   ;;  %s2553_s15 = inlined_call_operand.vmem [shape: f32[1,256], index: 15, kind: input, shape index: {}]   ;;  %s2554_s16 = inlined_call_operand.vmem [shape: f32[1,128], index: 16, kind: input, shape index: {}]   ;;  %s2555_s17 = inlined_call_operand.vmem [shape: f32[1,128], index: 17, kind: input, shape index: {}]   ;;  %s2556_s18 = inlined_call_operand.hbm [shape: f32[128,128], index: 18, kind: input, shape index: {}]   ;;  %s2557_s19 = inlined_call_operand.hbm [shape: f32[128,128], index: 19, kind: input, shape index: {}]   ;;  %s2558_s20 = inlined_call_operand.vmem [shape: f32[1,128], index: 20, kind: input, shape index: {}]   ;;  %s2559_s21 = inlined_call_operand.vmem [shape: f32[1,128], index: 21, kind: input, shape index: {}]   ;;  %s2560_s22 = inlined_call_operand.vmem [shape: f32[1,128], index: 22, kind: input, shape index: {}]   ;;  %s2561_s23 = inlined_call_operand.hbm [shape: f32[8,128], index: 23, kind: output, shape index: {}]  }
   0x1   :  { %2567 = sst [smem:[#allocation27_spill]] %s2538_s0 }
   0x2   :  { %2568 = sst [smem:[#allocation28_spill]] %s2539_s1 }
   0x3   :  { %2569 = sst [smem:[#allocation29_spill]] %s2540_s2 }
   0x4   :  { %2570 = sst [smem:[#allocation30_spill]] %s2541_s3 }
   0x5   :  { %2571 = sst [smem:[#allocation31_spill]] %s2542_s4 }
   0x6   :  { %2572 = sst [smem:[#allocation32_spill]] %s2543_s5 }
   0x7   :  { %2573 = sst [smem:[#allocation33_spill]] %s2544_s6 }
   0x8   :  { %2574 = sst [smem:[#allocation34_spill]] %s2545_s7 }
   0x9   :  { %2575 = sst [smem:[#allocation35_spill]] %s2559_s21 }
   0xa   :  { %2576 = sst [smem:[#allocation36_spill]] %s2560_s22 }
   0xb   :  { %2577 = sst [smem:[#allocation37_spill]] %s2561_s23 }
   0xc   :  { %28 = vsyncpa [#allocation3], 0 }
   0xd   :  { %29 = vsyncpa [#allocation6], 0 }
   0xe   :  { %30 = vsyncpa [#allocation9], 0 }
   0xf   :  { %31 = vsyncpa [#allocation12], 0 }
  0x10   :  { %32 = vsyncpa [#allocation15], 0 }
  0x11   :  { %33 = vsyncpa [#allocation18], 0 }
  0x12   :  { %34 = vsyncpa [#allocation4], 0  ;;  %s2131_s4 = smov [#allocation5]   ;;  %s2578_s5 = sld [smem:[#allocation28_spill]] }
  0x13   :  { %s50_s30 = sshll.u32 %s2131_s4, 4  ;;  %s51_s30 = int_to_ptr.vmem [resolvable:$true] %s50_s30 }
  0x18   :  { %s1875_s1 = scalar_lea.hbm %s2578_s5, 4096 }
  0x19   :  { %p1876_p0 = scmp.ne.s32.totalorder %s2578_s5, %s1875_s1  ;;  %p1879_p1 = scmp.lt.u32.totalorder %s1875_s1, %s2578_s5 }
  0x1b   :  { %p1881_p2 = pnand %p1879_p1, %p1876_p0 }
  0x1d   :  { %1884 = shalt.err (!%p1881_p2)
}
  0x1e   :  { %s1885_s7 = scalar_lea.vmem %s51_s30, 4096  ;;  %p1890_p4 = scmp.lt.s32.totalorder %s51_s30, %s51_s30 }
  0x1f   :  { %p1886_p3 = scmp.ne.s32.totalorder %s51_s30, %s1885_s7  ;;  %p1891_p5 = scmp.lt.s32.totalorder %s1885_s7, %s1885_s7 }
  0x21   :  { %p1892_p6 = por %p1891_p5, %p1890_p4 }
  0x23   :  { %p1893_p7 = pnand %p1892_p6, %p1886_p3 }
  0x25   :  { %1896 = shalt.err (!%p1893_p7)
}
  0x26   :  { %s2132_s28 = smov 256   ;;  %s2133_s29 = smov 16  }
  0x27   :  { %56 = dma.hbm_to_vmem [thread:$0]  %s2578_s5, 4096, %s51_s30, [#allocation6], %s2132_s28, %s2132_s28, %s2133_s29  }
  0x28   :  { %s2134_s4 = smov [#allocation8]   ;;  %s2135_s25 = smov [#allocation11]  }
  0x29   :  { %s76_s24 = sshll.u32 %s2134_s4, 4  ;;  %s106_s1 = sshll.u32 %s2135_s25, 4  ;;  %s77_s24 = int_to_ptr.vmem [resolvable:$true] %s76_s24  ;;  %s107_s1 = int_to_ptr.vmem [resolvable:$true] %s106_s1 }
  0x2a   :  { %s2579_s6 = sld [smem:[#allocation31_spill]] }
  0x30   :  { %s1897_s27 = scalar_lea.hbm %s2579_s6, 4096 }
  0x31   :  { %p1898_p8 = scmp.ne.s32.totalorder %s2579_s6, %s1897_s27  ;;  %p1901_p9 = scmp.lt.u32.totalorder %s1897_s27, %s2579_s6 }
  0x33   :  { %p1903_p10 = pnand %p1901_p9, %p1898_p8 }
  0x35   :  { %1906 = shalt.err (!%p1903_p10)
}
  0x36   :  { %s1907_s30 = scalar_lea.vmem %s77_s24, 4096  ;;  %p1912_p12 = scmp.lt.s32.totalorder %s77_s24, %s77_s24 }
  0x37   :  { %p1908_p11 = scmp.ne.s32.totalorder %s77_s24, %s1907_s30  ;;  %p1913_p13 = scmp.lt.s32.totalorder %s1907_s30, %s1907_s30 }
  0x39   :  { %p1914_p0 = por %p1913_p13, %p1912_p12 }
  0x3b   :  { %p1915_p1 = pnand %p1914_p0, %p1908_p11 }
  0x3d   :  { %1918 = shalt.err (!%p1915_p1)
}
  0x3e   :  { %s2136_s5 = smov 128   ;;  %s2137_s28 = smov 8  }
  0x3f   :  { %82 = dma.hbm_to_vmem [thread:$0]  %s2579_s6, 4096, %s77_s24, [#allocation9], %s2136_s5, %s2136_s5, %s2137_s28  }
  0x40   :  { %s1919_s3 = scalar_lea.hbm %s2547_s9, 2048 }
  0x41   :  { %p1920_p2 = scmp.ne.s32.totalorder %s2547_s9, %s1919_s3  ;;  %p1923_p3 = scmp.lt.u32.totalorder %s1919_s3, %s2547_s9 }
  0x43   :  { %p1925_p4 = pnand %p1923_p3, %p1920_p2 }
  0x45   :  { %1928 = shalt.err (!%p1925_p4)
}
  0x46   :  { %s1929_s2 = scalar_lea.vmem %s107_s1, 2048  ;;  %p1934_p6 = scmp.lt.s32.totalorder %s107_s1, %s107_s1 }
  0x47   :  { %p1930_p5 = scmp.ne.s32.totalorder %s107_s1, %s1929_s2  ;;  %p1935_p7 = scmp.lt.s32.totalorder %s1929_s2, %s1929_s2 }
  0x49   :  { %p1936_p8 = por %p1935_p7, %p1934_p6 }
  0x4b   :  { %p1937_p9 = pnand %p1936_p8, %p1930_p5 }
  0x4d   :  { %1940 = shalt.err (!%p1937_p9)
}
  0x4e   :  { %112 = dma.hbm_to_vmem [thread:$0]  %s2547_s9, 2048, %s107_s1, [#allocation12], %s2136_s5, %s2136_s5, %s2137_s28  }
  0x4f   :  { %s2138_s27 = smov [#allocation14]   ;;  %s2139_s30 = smov [#allocation2]  }
  0x50   :  { %s136_s7 = sshll.u32 %s2138_s27, 4  ;;  %s41_s23 = sshll.u32 %s2139_s30, 4  ;;  %s137_s7 = int_to_ptr.vmem [resolvable:$true] %s136_s7  ;;  %s42_s23 = int_to_ptr.vmem [resolvable:$true] %s41_s23 }
  0x51   :  { %s1941_s22 = scalar_lea.hbm %s2552_s14, 4096 }
  0x52   :  { %p1942_p10 = scmp.ne.s32.totalorder %s2552_s14, %s1941_s22  ;;  %p1945_p11 = scmp.lt.u32.totalorder %s1941_s22, %s2552_s14 }
  0x54   :  { %p1947_p12 = pnand %p1945_p11, %p1942_p10 }
  0x56   :  { %1950 = shalt.err (!%p1947_p12)
}
  0x57   :  { %s1951_s9 = scalar_lea.vmem %s137_s7, 4096  ;;  %p1956_p0 = scmp.lt.s32.totalorder %s137_s7, %s137_s7 }
  0x58   :  { %p1952_p13 = scmp.ne.s32.totalorder %s137_s7, %s1951_s9  ;;  %p1957_p1 = scmp.lt.s32.totalorder %s1951_s9, %s1951_s9 }
  0x5a   :  { %p1958_p2 = por %p1957_p1, %p1956_p0 }
  0x5c   :  { %p1959_p3 = pnand %p1958_p2, %p1952_p13 }
  0x5e   :  { %1962 = shalt.err (!%p1959_p3)
}
  0x5f   :  { %142 = dma.hbm_to_vmem [thread:$0]  %s2552_s14, 4096, %s137_s7, [#allocation15], %s2136_s5, %s2136_s5, %s2137_s28  }
  0x60   :  { %s2580_s6 = sld [smem:[#allocation27_spill]] }
  0x66   :  { %s1963_s27 = scalar_lea.hbm %s2580_s6, 128 }
  0x67   :  { %p1964_p4 = scmp.ne.s32.totalorder %s2580_s6, %s1963_s27  ;;  %p1967_p5 = scmp.lt.u32.totalorder %s1963_s27, %s2580_s6 }
  0x69   :  { %p1969_p6 = pnand %p1967_p5, %p1964_p4 }
  0x6b   :  { %1972 = shalt.err (!%p1969_p6)
}
  0x6c   :  { %s1973_s3 = scalar_lea.vmem %s42_s23, 128  ;;  %p1978_p8 = scmp.lt.s32.totalorder %s42_s23, %s42_s23 }
  0x6d   :  { %p1974_p7 = scmp.ne.s32.totalorder %s42_s23, %s1973_s3  ;;  %p1979_p9 = scmp.lt.s32.totalorder %s1973_s3, %s1973_s3 }
  0x6f   :  { %p1980_p10 = por %p1979_p9, %p1978_p8 }
  0x71   :  { %p1981_p11 = pnand %p1980_p10, %p1974_p7 }
  0x73   :  { %1984 = shalt.err (!%p1981_p11)
}
  0x74   :  { %44 = dma.hbm_to_vmem [thread:$0]  %s2580_s6, 128, %s42_s23, [#allocation3]  }
  0x75   :  { %s2140_s0 = smov [#allocation7]   ;;  %s2141_s25 = smov [#allocation10]  }
  0x76   :  { %s64_s4 = sshll.u32 %s2140_s0, 4  ;;  %s94_s9 = sshll.u32 %s2141_s25, 4  ;;  %s65_s4 = int_to_ptr.vmem [resolvable:$true] %s64_s4  ;;  %s95_s9 = int_to_ptr.vmem [resolvable:$true] %s94_s9 }
  0x77   :  { %s2581_s2 = sld [smem:[#allocation30_spill]] }
  0x7d   :  { %s1985_s24 = scalar_lea.hbm %s2581_s2, 4096 }
  0x7e   :  { %p1986_p12 = scmp.ne.s32.totalorder %s2581_s2, %s1985_s24  ;;  %p1989_p13 = scmp.lt.u32.totalorder %s1985_s24, %s2581_s2 }
  0x80   :  { %p1991_p0 = pnand %p1989_p13, %p1986_p12 }
  0x82   :  { %1994 = shalt.err (!%p1991_p0)
}
  0x83   :  { %s1995_s23 = scalar_lea.vmem %s65_s4, 4096  ;;  %p2000_p2 = scmp.lt.s32.totalorder %s65_s4, %s65_s4 }
  0x84   :  { %p1996_p1 = scmp.ne.s32.totalorder %s65_s4, %s1995_s23  ;;  %p2001_p3 = scmp.lt.s32.totalorder %s1995_s23, %s1995_s23 }
  0x86   :  { %p2002_p4 = por %p2001_p3, %p2000_p2 }
  0x88   :  { %p2003_p5 = pnand %p2002_p4, %p1996_p1 }
  0x8a   :  { %2006 = shalt.err (!%p2003_p5)
}
  0x8b   :  { %70 = dma.hbm_to_vmem [thread:$0]  %s2581_s2, 4096, %s65_s4, [#allocation6], %s2136_s5, %s2136_s5, %s2137_s28  }
  0x8c   :  { %s2007_s7 = scalar_lea.hbm %s2546_s8, 2048 }
  0x8d   :  { %p2008_p6 = scmp.ne.s32.totalorder %s2546_s8, %s2007_s7  ;;  %p2011_p7 = scmp.lt.u32.totalorder %s2007_s7, %s2546_s8 }
  0x8f   :  { %p2013_p8 = pnand %p2011_p7, %p2008_p6 }
  0x91   :  { %2016 = shalt.err (!%p2013_p8)
}
  0x92   :  { %s2017_s24 = scalar_lea.vmem %s95_s9, 2048  ;;  %p2022_p10 = scmp.lt.s32.totalorder %s95_s9, %s95_s9 }
  0x93   :  { %p2018_p9 = scmp.ne.s32.totalorder %s95_s9, %s2017_s24  ;;  %p2023_p11 = scmp.lt.s32.totalorder %s2017_s24, %s2017_s24 }
  0x95   :  { %p2024_p12 = por %p2023_p11, %p2022_p10 }
  0x97   :  { %p2025_p13 = pnand %p2024_p12, %p2018_p9 }
  0x99   :  { %2028 = shalt.err (!%p2025_p13)
}
  0x9a   :  { %100 = dma.hbm_to_vmem [thread:$0]  %s2546_s8, 2048, %s95_s9, [#allocation9], %s2136_s5, %s2136_s5, %s2137_s28  }
  0x9b   :  { %s2142_s27 = smov [#allocation13]   ;;  %s2143_s29 = smov [#allocation16]  }
  0x9c   :  { %s124_s30 = sshll.u32 %s2142_s27, 4  ;;  %s154_s21 = sshll.u32 %s2143_s29, 4  ;;  %s125_s30 = int_to_ptr.vmem [resolvable:$true] %s124_s30  ;;  %s155_s21 = int_to_ptr.vmem [resolvable:$true] %s154_s21 }
  0x9d   :  { %s2029_s22 = scalar_lea.hbm %s2551_s13, 4096 }
  0x9e   :  { %p2030_p0 = scmp.ne.s32.totalorder %s2551_s13, %s2029_s22  ;;  %p2033_p1 = scmp.lt.u32.totalorder %s2029_s22, %s2551_s13 }
  0xa0   :  { %p2035_p2 = pnand %p2033_p1, %p2030_p0 }
  0xa2   :  { %2038 = shalt.err (!%p2035_p2)
}
  0xa3   :  { %s2039_s8 = scalar_lea.vmem %s125_s30, 4096  ;;  %p2044_p4 = scmp.lt.s32.totalorder %s125_s30, %s125_s30 }
  0xa4   :  { %p2040_p3 = scmp.ne.s32.totalorder %s125_s30, %s2039_s8  ;;  %p2045_p5 = scmp.lt.s32.totalorder %s2039_s8, %s2039_s8 }
  0xa6   :  { %p2046_p6 = por %p2045_p5, %p2044_p4 }
  0xa8   :  { %p2047_p7 = pnand %p2046_p6, %p2040_p3 }
  0xaa   :  { %2050 = shalt.err (!%p2047_p7)
}
  0xab   :  { %130 = dma.hbm_to_vmem [thread:$0]  %s2551_s13, 4096, %s125_s30, [#allocation12], %s2136_s5, %s2136_s5, %s2137_s28  }
  0xac   :  { %s2051_s24 = scalar_lea.hbm %s2556_s18, 2048 }
  0xad   :  { %p2052_p8 = scmp.ne.s32.totalorder %s2556_s18, %s2051_s24  ;;  %p2055_p9 = scmp.lt.u32.totalorder %s2051_s24, %s2556_s18 }
  0xaf   :  { %p2057_p10 = pnand %p2055_p9, %p2052_p8 }
  0xb1   :  { %2060 = shalt.err (!%p2057_p10)
}
  0xb2   :  { %s2061_s23 = scalar_lea.vmem %s155_s21, 2048  ;;  %p2066_p12 = scmp.lt.s32.totalorder %s155_s21, %s155_s21 }
  0xb3   :  { %p2062_p11 = scmp.ne.s32.totalorder %s155_s21, %s2061_s23  ;;  %p2067_p13 = scmp.lt.s32.totalorder %s2061_s23, %s2061_s23 }
  0xb5   :  { %p2068_p0 = por %p2067_p13, %p2066_p12 }
  0xb7   :  { %p2069_p1 = pnand %p2068_p0, %p2062_p11 }
  0xb9   :  { %2072 = shalt.err (!%p2069_p1)
}
  0xba   :  { %160 = dma.hbm_to_vmem [thread:$0]  %s2556_s18, 2048, %s155_s21, [#allocation15], %s2136_s5, %s2136_s5, %s2137_s28  }
  0xbb   :  { %s2144_s6 = smov [#allocation17]   ;;  %s2073_s7 = scalar_lea.hbm %s2557_s19, 2048 }
  0xbc   :  { %s166_s22 = sshll.u32 %s2144_s6, 4  ;;  %p2074_p2 = scmp.ne.s32.totalorder %s2557_s19, %s2073_s7  ;;  %s167_s22 = int_to_ptr.vmem [resolvable:$true] %s166_s22 }
  0xbd   :  { %p2077_p3 = scmp.lt.u32.totalorder %s2073_s7, %s2557_s19 }
  0xbf   :  { %p2079_p4 = pnand %p2077_p3, %p2074_p2 }
  0xc1   :  { %2082 = shalt.err (!%p2079_p4)
}
  0xc2   :  { %s2083_s1 = scalar_lea.vmem %s167_s22, 2048  ;;  %p2088_p6 = scmp.lt.s32.totalorder %s167_s22, %s167_s22 }
  0xc3   :  { %p2084_p5 = scmp.ne.s32.totalorder %s167_s22, %s2083_s1  ;;  %p2089_p7 = scmp.lt.s32.totalorder %s2083_s1, %s2083_s1 }
  0xc5   :  { %p2090_p8 = por %p2089_p7, %p2088_p6 }
  0xc7   :  { %p2091_p9 = pnand %p2090_p8, %p2084_p5 }
  0xc9   :  { %2094 = shalt.err (!%p2091_p9)
}
  0xca   :  { %172 = dma.hbm_to_vmem [thread:$0]  %s2557_s19, 2048, %s167_s22, [#allocation18], %s2136_s5, %s2136_s5, %s2137_s28  }
  0xcb   :  { %2117 = dma.done.wait [#allocation3], 128  }
  0xcc   :  { %2118 = vsyncadd [#allocation3], 4294967168 }
  0xcd   :  { %2119 = dma.done.wait [#allocation6], 8192  }
  0xce   :  { %2120 = vsyncadd [#allocation6], 4294959104 }
  0xcf   :  { %2121 = dma.done.wait [#allocation9], 6144  }
  0xd0   :  { %2122 = vsyncadd [#allocation9], 4294961152 }
  0xd1   :  { %2123 = dma.done.wait [#allocation12], 6144  }
  0xd2   :  { %2124 = vsyncadd [#allocation12], 4294961152 }
  0xd3   :  { %2125 = dma.done.wait [#allocation15], 6144  }
  0xd4   :  { %2126 = vsyncadd [#allocation15], 4294961152 }
  0xd5   :  { %2127 = dma.done.wait [#allocation18], 2048  }
  0xd6   :  { %2128 = vsyncadd [#allocation18], 4294965248  ;;  %v2145_v0 = vmov 0.0   ;;  %v211_v1 = vld [vmem:[#allocation5 + $0x8] sm:$0xff]  ;;  %v213_v2 = vld [vmem:[#allocation5 + $0x18] sm:$0xff]  ;;  %s2582_s28 = sld [smem:[#allocation29_spill]] }
  0xd7   :  { %318 = vmatprep.mubr.f32.mxu0 %v2145_v0  ;;  %v210_v3 = vld [vmem:[#allocation5] sm:$0xff]  ;;  %v1591_v4 = vpack.c.bf16 %v213_v2, %v211_v1  ;;  %v212_v5 = vld [vmem:[#allocation5 + $0x10] sm:$0xff]  ;;  %v215_v6 = vld [vmem:[#allocation5 + $0x28] sm:$0xff]  ;;  %s2583_s4 = sld [smem:[#allocation32_spill]]  ;;  %vm2147_vm0 = vmmov 0   ;;  %s2584_s29 = sld [smem:[#allocation33_spill]] }
  0xd8   :  { %v217_v7 = vld [vmem:[#allocation5 + $0x38] sm:$0xff]  ;;  %v1593_v8 = vpack.c.bf16 %v212_v5, %v210_v3  ;;  %v214_v10 = vld [vmem:[#allocation5 + $0x20] sm:$0xff]  ;;  %v216_v11 = vld [vmem:[#allocation5 + $0x30] sm:$0xff]  ;;  %s2585_s30 = sld [smem:[#allocation34_spill]]  ;;  %s2586_s18 = sld [smem:[#allocation35_spill]] }
  0xd9   :  { %v1595_v9 = vpack.c.bf16 %v217_v7, %v215_v6  ;;  %v219_v12 = vld [vmem:[#allocation5 + $0x48] sm:$0xff]  ;;  %1592 = vmatprep.subr.bf16.mxu0 %v1591_v4  ;;  %v221_v13 = vld [vmem:[#allocation5 + $0x58] sm:$0xff]  ;;  %v1597_v14 = vpack.c.bf16 %v216_v11, %v214_v10  ;;  %v218_v16 = vld [vmem:[#allocation5 + $0x40] sm:$0xff]  ;;  %s2587_s19 = sld [smem:[#allocation36_spill]]  ;;  %s2148_s26 = smov [#allocation19]  }
  0xda   :  { %1594 = vmatpush1.bf16.msra.mxu0 %v1593_v8  ;;  %v1599_v15 = vpack.c.bf16 %v221_v13, %v219_v12  ;;  %v220_v17 = vld [vmem:[#allocation5 + $0x50] sm:$0xff]  ;;  %v223_v18 = vld [vmem:[#allocation5 + $0x68] sm:$0xff]  ;;  %v225_v19 = vld [vmem:[#allocation5 + $0x78] sm:$0xff]  ;;  %s1219_s24 = sshll.u32 %s2148_s26, 4  ;;  %s1220_s24 = int_to_ptr.vmem [resolvable:$true] %s1219_s24 }
  0xdb   :  { %1596 = vmatprep.subr.bf16.mxu0 %v1595_v9  ;;  %v1601_v20 = vpack.c.bf16 %v220_v17, %v218_v16  ;;  %v1603_v21 = vpack.c.bf16 %v225_v19, %v223_v18  ;;  %v222_v22 = vld [vmem:[#allocation5 + $0x60] sm:$0xff]  ;;  %v224_v23 = vld [vmem:[#allocation5 + $0x70] sm:$0xff]  ;;  %v227_v24 = vld [vmem:[#allocation5 + $0x88] sm:$0xff]  ;;  %p2100_p11 = scmp.lt.s32.totalorder %s1220_s24, %s1220_s24 }
  0xdc   :  { %v229_v25 = vld [vmem:[#allocation5 + $0x98] sm:$0xff]  ;;  %v1605_v26 = vpack.c.bf16 %v224_v23, %v222_v22  ;;  %v226_v27 = vld [vmem:[#allocation5 + $0x80] sm:$0xff]  ;;  %v390_v29 = vld [vmem:[#allocation8 + $0x88] sm:$0xff] }
  0xdd   :  { %v389_v28 = vld [vmem:[#allocation8 + $0x80] sm:$0xff]  ;;  %v1607_v30 = vpack.c.bf16 %v229_v25, %v227_v24  ;;  %v228_v31 = vld [vmem:[#allocation5 + $0x90] sm:$0xff]  ;;  %v374_v34 = vld [vmem:[#allocation8 + $0x8] sm:$0xff] }
  0xde   :  { %1598 = vmatpush1.bf16.msra.mxu0 %v1597_v14  ;;  %v1623_v32 = vpack.c.bf16 %v390_v29, %v389_v28  ;;  %v373_v33 = vld [vmem:[#allocation8] sm:$0xff]  ;;  %v231_v35 = vld [vmem:[#allocation5 + $0xa8] sm:$0xff]  ;;  %v233_v36 = vld [vmem:[#allocation5 + $0xb8] sm:$0xff]  ;;  %v1609_v41 = vpack.c.bf16 %v228_v31, %v226_v27 }
  0xdf   :  { %1600 = vmatprep.subr.bf16.mxu0 %v1599_v15  ;;  %v1625_v37 = vpack.c.bf16 %v374_v34, %v373_v33  ;;  %v391_v38 = vld [vmem:[#allocation8 + $0x90] sm:$0xff]  ;;  %v392_v39 = vld [vmem:[#allocation8 + $0x98] sm:$0xff]  ;;  %v230_v42 = vld [vmem:[#allocation5 + $0xa0] sm:$0xff]  ;;  %v1611_v46 = vpack.c.bf16 %v233_v36, %v231_v35 }
  0xe0   :  { %1624 = vmatprep.subr.bf16.mxu1 %v1623_v32  ;;  %v375_v40 = vld [vmem:[#allocation8 + $0x10] sm:$0xff]  ;;  %v1627_v44 = vpack.c.bf16 %v392_v39, %v391_v38  ;;  %v376_v45 = vld [vmem:[#allocation8 + $0x18] sm:$0xff]  ;;  %v235_v47 = vld [vmem:[#allocation5 + $0xc8] sm:$0xff] }
  0xe1   :  { %v232_v43 = vld [vmem:[#allocation5 + $0xb0] sm:$0xff]  ;;  %1626 = vmatpush3.bf16.msra.mxu1 %v1625_v37  ;;  %v237_v48 = vld [vmem:[#allocation5 + $0xd8] sm:$0xff]  ;;  %v1629_v49 = vpack.c.bf16 %v376_v45, %v375_v40  ;;  %v393_v50 = vld [vmem:[#allocation8 + $0xa0] sm:$0xff] }
  0xe2   :  { %1602 = vmatpush1.bf16.msra.mxu0 %v1601_v20  ;;  %1628 = vmatprep.subr.bf16.mxu1 %v1627_v44  ;;  %v394_v51 = vld [vmem:[#allocation8 + $0xa8] sm:$0xff]  ;;  %v377_v52 = vld [vmem:[#allocation8 + $0x20] sm:$0xff]  ;;  %v1613_v55 = vpack.c.bf16 %v232_v43, %v230_v42  ;;  %v395_v58 = vld [vmem:[#allocation8 + $0xb0] sm:$0xff]  ;;  %v1615_v60 = vpack.c.bf16 %v237_v48, %v235_v47 }
  0xe3   :  { %1604 = vmatprep.subr.bf16.mxu0 %v1603_v21  ;;  %v378_v53 = vld [vmem:[#allocation8 + $0x28] sm:$0xff]  ;;  %v1631_v54 = vpack.c.bf16 %v394_v51, %v393_v50  ;;  %v234_v56 = vld [vmem:[#allocation5 + $0xc0] sm:$0xff]  ;;  %v396_v59 = vld [vmem:[#allocation8 + $0xb8] sm:$0xff] }
  0xe4   :  { %v1633_v57 = vpack.c.bf16 %v378_v53, %v377_v52  ;;  %v236_v61 = vld [vmem:[#allocation5 + $0xd0] sm:$0xff]  ;;  %v1635_v62 = vpack.c.bf16 %v396_v59, %v395_v58  ;;  %v380_v1 = vld [vmem:[#allocation8 + $0x38] sm:$0xff]  ;;  %v239_v2 = vld [vmem:[#allocation5 + $0xe8] sm:$0xff] }
  0xe5   :  { %1630 = vmatpush3.bf16.msra.mxu1 %v1629_v49  ;;  %v379_v63 = vld [vmem:[#allocation8 + $0x30] sm:$0xff]  ;;  %v241_v3 = vld [vmem:[#allocation5 + $0xf8] sm:$0xff]  ;;  %v1617_v4 = vpack.c.bf16 %v236_v61, %v234_v56  ;;  %v238_v7 = vld [vmem:[#allocation5 + $0xe0] sm:$0xff] }
  0xe6   :  { %1606 = vmatpush1.bf16.msra.mxu0 %v1605_v26  ;;  %1632 = vmatprep.subr.bf16.mxu1 %v1631_v54  ;;  %v1637_v5 = vpack.c.bf16 %v380_v1, %v379_v63  ;;  %v1619_v6 = vpack.c.bf16 %v241_v3, %v239_v2  ;;  %v240_v8 = vld [vmem:[#allocation5 + $0xf0] sm:$0xff]  ;;  %v343_v9 = vld [vmem:[#allocation7 + $0x80] sm:$0xff]  ;;  %v344_v10 = vld [vmem:[#allocation7 + $0x88] sm:$0xff] }
  0xe7   :  { %1608 = vmatprep.subr.bf16.mxu0 %v1607_v30  ;;  %v1621_v11 = vpack.c.bf16 %v240_v8, %v238_v7  ;;  %v1655_v12 = vpack.c.bf16 %v344_v10, %v343_v9  ;;  %v327_v13 = vld [vmem:[#allocation7] sm:$0xff]  ;;  %v328_v14 = vld [vmem:[#allocation7 + $0x8] sm:$0xff]  ;;  %v345_v15 = vld [vmem:[#allocation7 + $0x90] sm:$0xff] }
  0xe8   :  { %v346_v16 = vld [vmem:[#allocation7 + $0x98] sm:$0xff]  ;;  %v1657_v18 = vpack.c.bf16 %v328_v14, %v327_v13  ;;  %v329_v20 = vld [vmem:[#allocation7 + $0x10] sm:$0xff]  ;;  %v347_v22 = vld [vmem:[#allocation7 + $0xa0] sm:$0xff] }
  0xe9   :  { %1634 = vmatpush3.bf16.msra.mxu1 %v1633_v57  ;;  %v209_v17 = vld [vmem:[#allocation2] sm:$0xff]  ;;  %v1659_v19 = vpack.c.bf16 %v346_v16, %v345_v15  ;;  %v348_v23 = vld [vmem:[#allocation7 + $0xa8] sm:$0xff]  ;;  %v331_v26 = vld [vmem:[#allocation7 + $0x20] sm:$0xff] }
  0xea   :  { %1610 = vmatpush1.bf16.msra.mxu0 %v1609_v41  ;;  %1636 = vmatprep.subr.bf16.mxu1 %v1635_v62  ;;  %v330_v21 = vld [vmem:[#allocation7 + $0x18] sm:$0xff]  ;;  %v1663_v25 = vpack.c.bf16 %v348_v23, %v347_v22  ;;  %v332_v27 = vld [vmem:[#allocation7 + $0x28] sm:$0xff]  ;;  %v349_v28 = vld [vmem:[#allocation7 + $0xb0] sm:$0xff] }
  0xeb   :  { %1612 = vmatprep.subr.bf16.mxu0 %v1611_v46  ;;  %v1661_v24 = vpack.c.bf16 %v330_v21, %v329_v20  ;;  %v350_v29 = vld [vmem:[#allocation7 + $0xb8] sm:$0xff]  ;;  %v1665_v30 = vpack.c.bf16 %v332_v27, %v331_v26  ;;  %v333_v32 = vld [vmem:[#allocation7 + $0x30] sm:$0xff]  ;;  %v351_v35 = vld [vmem:[#allocation7 + $0xc0] sm:$0xff]  ;;  %v2146_v20 = vmov 0.0|0.0   ;;  %v244_v21 = vlaneseq }
  0xec   :  { %v1667_v31 = vpack.c.bf16 %v350_v29, %v349_v28  ;;  %v334_v33 = vld [vmem:[#allocation7 + $0x38] sm:$0xff]  ;;  %v352_v36 = vld [vmem:[#allocation7 + $0xc8] sm:$0xff]  ;;  %v335_v38 = vld [vmem:[#allocation7 + $0x40] sm:$0xff] }
  0xed   :  { %1638 = vmatpush3.bf16.msra.mxu1 %v1637_v5  ;;  %v1669_v34 = vpack.c.bf16 %v334_v33, %v333_v32  ;;  %v1671_v37 = vpack.c.bf16 %v352_v36, %v351_v35  ;;  %v336_v39 = vld [vmem:[#allocation7 + $0x48] sm:$0xff]  ;;  %v397_v41 = vld [vmem:[#allocation8 + $0xc0] sm:$0xff]  ;;  %v353_v47 = vld [vmem:[#allocation7 + $0xd0] sm:$0xff]  ;;  %v2417_v22 = vshrl.u32 %v244_v21, 7 }
  0xee   :  { %1614 = vmatpush1.bf16.msra.mxu0 %v1613_v55  ;;  %v1673_v40 = vpack.c.bf16 %v336_v39, %v335_v38  ;;  %v398_v42 = vld [vmem:[#allocation8 + $0xc8] sm:$0xff]  ;;  %v381_v44 = vld [vmem:[#allocation8 + $0x40] sm:$0xff]  ;;  %v354_v48 = vld [vmem:[#allocation7 + $0xd8] sm:$0xff] }
  0xef   :  { %1616 = vmatprep.subr.bf16.mxu0 %v1615_v60  ;;  %v1639_v43 = vpack.c.bf16 %v398_v42, %v397_v41  ;;  %v382_v45 = vld [vmem:[#allocation8 + $0x48] sm:$0xff]  ;;  %v1675_v49 = vpack.c.bf16 %v354_v48, %v353_v47  ;;  %v337_v50 = vld [vmem:[#allocation7 + $0x50] sm:$0xff]  ;;  %v338_v51 = vld [vmem:[#allocation7 + $0x58] sm:$0xff]  ;;  %v2420_v23 = vsub.s32 0, %v2417_v22  ;;  %vm1193_vm1 = vcmp.lt.s32.totalorder %v2417_v22, 4 }
  0xf0   :  { %v1641_v46 = vpack.c.bf16 %v382_v45, %v381_v44  ;;  %v1677_v52 = vpack.c.bf16 %v338_v51, %v337_v50  ;;  %v399_v53 = vld [vmem:[#allocation8 + $0xd0] sm:$0xff]  ;;  %v400_v54 = vld [vmem:[#allocation8 + $0xd8] sm:$0xff]  ;;  %v355_v58 = vld [vmem:[#allocation7 + $0xe0] sm:$0xff] }
  0xf1   :  { %1640 = vmatprep.subr.bf16.mxu1 %v1639_v43  ;;  %v1643_v55 = vpack.c.bf16 %v400_v54, %v399_v53  ;;  %v383_v56 = vld [vmem:[#allocation8 + $0x50] sm:$0xff]  ;;  %v384_v57 = vld [vmem:[#allocation8 + $0x58] sm:$0xff]  ;;  %v356_v60 = vld [vmem:[#allocation7 + $0xe8] sm:$0xff] }
  0xf2   :  { %1618 = vmatpush1.bf16.msra.mxu0 %v1617_v4  ;;  %1642 = vmatpush3.bf16.msra.mxu1 %v1641_v46  ;;  %v1645_v59 = vpack.c.bf16 %v384_v57, %v383_v56  ;;  %v339_v61 = vld [vmem:[#allocation7 + $0x60] sm:$0xff]  ;;  %v340_v62 = vld [vmem:[#allocation7 + $0x68] sm:$0xff]  ;;  %v1679_v63 = vpack.c.bf16 %v356_v60, %v355_v58  ;;  %v357_v7 = vld [vmem:[#allocation7 + $0xf0] sm:$0xff] }
  0xf3   :  { %1620 = vmatprep.subr.bf16.mxu0 %v1619_v6  ;;  %1644 = vmatprep.subr.bf16.mxu1 %v1643_v55  ;;  %v1681_v1 = vpack.c.bf16 %v340_v62, %v339_v61  ;;  %v401_v2 = vld [vmem:[#allocation8 + $0xe0] sm:$0xff]  ;;  %v402_v3 = vld [vmem:[#allocation8 + $0xe8] sm:$0xff]  ;;  %v358_v8 = vld [vmem:[#allocation7 + $0xf8] sm:$0xff] }
  0xf4   :  { %v385_v4 = vld [vmem:[#allocation8 + $0x60] sm:$0xff]  ;;  %v1647_v5 = vpack.c.bf16 %v402_v3, %v401_v2  ;;  %v386_v6 = vld [vmem:[#allocation8 + $0x68] sm:$0xff]  ;;  %v1683_v10 = vpack.c.bf16 %v358_v8, %v357_v7  ;;  %v403_v13 = vld [vmem:[#allocation8 + $0xf0] sm:$0xff] }
  0xf5   :  { %v1649_v9 = vpack.c.bf16 %v386_v6, %v385_v4  ;;  %v404_v15 = vld [vmem:[#allocation8 + $0xf8] sm:$0xff]  ;;  %v387_v16 = vld [vmem:[#allocation8 + $0x70] sm:$0xff]  ;;  %v562_v33 = vld [vmem:[#allocation10] sm:$0xff] }
  0xf6   :  { %1622 = vmatpush1.bf16.msra.mxu0 %v1621_v11  ;;  %1646 = vmatpush3.bf16.msra.mxu1 %v1645_v59  ;;  %v341_v11 = vld [vmem:[#allocation7 + $0x70] sm:$0xff]  ;;  %v359_v32 = vld [vmem:[%s2583_s4] sm:$0x3]  ;;  %v587_v38 = vld [vmem:[#allocation11 + $0x8] sm:$0xff]  ;;  %s2095_s4 = scalar_lea.vmem %s1220_s24, 128 }
  0xf7   :  { %1656 = vmatprep.subr.bf16.mxu0 %v1655_v12  ;;  %v342_v12 = vld [vmem:[#allocation7 + $0x78] sm:$0xff]  ;;  %1648 = vmatprep.subr.bf16.mxu1 %v1647_v5  ;;  %v364_v36 = vrot.slane %v359_v32, %v2420_v23  ;;  %v564_v42 = vld [vmem:[#allocation10 + $0x10] sm:$0xff]  ;;  %v566_v50 = vld [vmem:[#allocation10 + $0x20] sm:$0xff]  ;;  %p2096_p10 = scmp.ne.s32.totalorder %s1220_s24, %s2095_s4  ;;  %p2101_p12 = scmp.lt.s32.totalorder %s2095_s4, %s2095_s4 }
  0xf8   :  { %v1685_v14 = vpack.c.bf16 %v342_v12, %v341_v11  ;;  %v565_v43 = vld [vmem:[#allocation10 + $0x18] sm:$0xff]  ;;  %v588_v47 = vld [vmem:[#allocation11 + $0x10] sm:$0xff]  ;;  %v567_v51 = vld [vmem:[#allocation10 + $0x28] sm:$0xff] }
  0xf9   :  { %319 = vmatmul.mubr.f32.vlgmr.msra.gmra.mrb[0].mxu0 %v209_v17  ;;  %v388_v17 = vld [vmem:[#allocation8 + $0x78] sm:$0xff]  ;;  %v1718_v53 = vpack.c.bf16 %v567_v51, %v566_v50  ;;  %v590_v54 = vld [vmem:[#allocation11 + $0x20] sm:$0xff]  ;;  %v591_v55 = vld [vmem:[#allocation11 + $0x28] sm:$0xff]  ;;  %p2102_p13 = por %p2101_p12, %p2100_p11 }
  0xfa   :  { %1658 = vmatpush3.bf16.msra.mxu0 %v1657_v18  ;;  %v1651_v18 = vpack.c.bf16 %v404_v15, %v403_v13  ;;  %1650 = vmatpush3.bf16.msra.mxu1 %v1649_v9  ;;  %v589_v48 = vld [vmem:[#allocation11 + $0x18] sm:$0xff]  ;;  %v1694_v56 = vpack.c.bf16 %v591_v55, %v590_v54  ;;  %v568_v57 = vld [vmem:[#allocation10 + $0x30] sm:$0xff]  ;;  %v594_v3 = vld [vmem:[#allocation11 + $0x40] sm:$0xff] }
  0xfb   :  { %1660 = vmatprep.subr.bf16.mxu0 %v1659_v19  ;;  %v1653_v19 = vpack.c.bf16 %v388_v17, %v387_v16  ;;  %v569_v58 = vld [vmem:[#allocation10 + $0x38] sm:$0xff]  ;;  %v592_v60 = vld [vmem:[#allocation11 + $0x30] sm:$0xff]  ;;  %v595_v4 = vld [vmem:[#allocation11 + $0x48] sm:$0xff]  ;;  %p2103_p0 = pnand %p2102_p13, %p2096_p10 }
  0xfc   :  { %1652 = vmatprep.subr.bf16.mxu1 %v1651_v18  ;;  %v1721_v59 = vpack.c.bf16 %v569_v58, %v568_v57  ;;  %v593_v61 = vld [vmem:[#allocation11 + $0x38] sm:$0xff]  ;;  %v1700_v5 = vpack.c.bf16 %v595_v4, %v594_v3  ;;  %v572_v6 = vld [vmem:[#allocation10 + $0x50] sm:$0xff]  ;;  %v574_v12 = vld [vmem:[#allocation10 + $0x60] sm:$0xff] }
  0xfd   :  { %v1697_v62 = vpack.c.bf16 %v593_v61, %v592_v60  ;;  %v573_v7 = vld [vmem:[#allocation10 + $0x58] sm:$0xff]  ;;  %v596_v9 = vld [vmem:[#allocation11 + $0x50] sm:$0xff]  ;;  %v575_v13 = vld [vmem:[#allocation10 + $0x68] sm:$0xff] }
  0xfe   :  { %1662 = vmatpush3.bf16.msra.mxu0 %v1661_v24  ;;  %1654 = vmatpush3.bf16.msra.mxu1 %v1653_v19  ;;  %v242_v24 = vld [vmem:[%s2582_s28] sm:$0x3]  ;;  %v1727_v8 = vpack.c.bf16 %v573_v7, %v572_v6  ;;  %v1730_v15 = vpack.c.bf16 %v575_v13, %v574_v12  ;;  %v599_v16 = vld [vmem:[#allocation11 + $0x68] sm:$0xff]  ;;  %v576_v17 = vld [vmem:[#allocation10 + $0x70] sm:$0xff] }
  0xff   :  { %1664 = vmatprep.subr.bf16.mxu0 %v1663_v25  ;;  %1687 = vmatprep.subr.bf16.mxu1 %v2146_v20  ;;  %v2426_v25 = vsub.s32 1, %v2417_v22  ;;  %v247_v26 = vrot.slane %v242_v24, %v2420_v23  ;;  %v577_v18 = vld [vmem:[#allocation10 + $0x78] sm:$0xff]  ;;  %v776_v51 = vld [vmem:[#allocation13 + $0x90] sm:$0xff]  ;;  %v805_v54 = vld [vmem:[#allocation14 + $0x8] sm:$0xff] }
 0x100   :  { %v2470_v50 = vld [vmem:[%s2553_s15] sm:$0x3]  ;;  %v822_v58 = vld [vmem:[#allocation14 + $0x90] sm:$0xff]  ;;  %v779_v3 = vld [vmem:[#allocation13 + $0xa8] sm:$0xff] }
 0x101   :  { %v251_v27 = vrot.slane %v242_v24, %v2426_v25  ;;  %v368_v35 = vrot.slane %v359_v32, %v2426_v25  ;;  %v600_v24 = vld [vmem:[#allocation11 + $0x70] sm:$0xff]  ;;  %v820_v32 = vld [vmem:[#allocation14 + $0x80] sm:$0xff]  ;;  %v799_v57 = vrot.slane %v2470_v50, %v2426_v25  ;;  %v807_v7 = vld [vmem:[#allocation14 + $0x18] sm:$0xff] }
 0x102   :  { %1666 = vmatpush3.bf16.msra.mxu0 %v1665_v30  ;;  %v760_v61 = vld [vmem:[#allocation13 + $0x10] sm:$0xff]  ;;  %v762_v12 = vld [vmem:[#allocation13 + $0x20] sm:$0xff]  ;;  %v763_v13 = vld [vmem:[#allocation13 + $0x28] sm:$0xff] }
 0x103   :  { %1668 = vmatprep.subr.bf16.mxu0 %v1667_v31  ;;  %v806_v6 = vld [vmem:[#allocation14 + $0x10] sm:$0xff] }
 0x106   :  { %1670 = vmatpush3.bf16.msra.mxu0 %v1669_v34  ;;  %v563_v34 = vld [vmem:[#allocation10 + $0x8] sm:$0xff] }
 0x107   :  { %1672 = vmatprep.subr.bf16.mxu0 %v1671_v37  ;;  %v586_v37 = vld [vmem:[#allocation11] sm:$0xff] }
 0x108   :  { %v1688_v45 = vpack.c.bf16 %v587_v38, %v586_v37 }
 0x10a   :  { %1674 = vmatpush3.bf16.msra.mxu0 %v1673_v40  ;;  %v1712_v40 = vpack.c.bf16 %v563_v34, %v562_v33  ;;  %v821_v33 = vld [vmem:[#allocation14 + $0x88] sm:$0xff] }
 0x10b   :  { %1676 = vmatprep.subr.bf16.mxu0 %v1675_v49  ;;  %v1715_v49 = vpack.c.bf16 %v565_v43, %v564_v42  ;;  %v1735_v34 = vpack.c.bf16 %v821_v33, %v820_v32  ;;  %v1233_v42 = vld [vmem:[%s2584_s29] ss:$0 sm:$0xff]  ;;  %v783_v32 = vld [vmem:[#allocation13 + $0xc8] sm:$0xff] }
 0x10e   :  { %1678 = vmatpush3.bf16.msra.mxu0 %v1677_v52  ;;  %v1691_v52 = vpack.c.bf16 %v589_v48, %v588_v47  ;;  %v758_v48 = vld [vmem:[#allocation13] sm:$0xff] }
 0x10f   :  { %1680 = vmatprep.subr.bf16.mxu0 %v1679_v63  ;;  %v570_v63 = vld [vmem:[#allocation10 + $0x40] sm:$0xff] }
 0x112   :  { %1682 = vmatpush3.bf16.msra.mxu0 %v1681_v1  ;;  %v571_v1 = vld [vmem:[#allocation10 + $0x48] sm:$0xff] }
 0x113   :  { %1684 = vmatprep.subr.bf16.mxu0 %v1683_v10  ;;  %v1724_v2 = vpack.c.bf16 %v571_v1, %v570_v63  ;;  %v597_v10 = vld [vmem:[#allocation11 + $0x58] sm:$0xff] }
 0x114   :  { %v1703_v11 = vpack.c.bf16 %v597_v10, %v596_v9  ;;  %v824_v9 = vld [vmem:[#allocation14 + $0xa0] sm:$0xff]  ;;  %v825_v10 = vld [vmem:[#allocation14 + $0xa8] sm:$0xff] }
 0x116   :  { %1686 = vmatpush3.bf16.msra.mxu0 %v1685_v14  ;;  %v598_v14 = vld [vmem:[#allocation11 + $0x60] sm:$0xff] }
 0x117   :  { %1711 = vmatprep.subr.bf16.mxu0 %v2146_v20  ;;  %v1706_v19 = vpack.c.bf16 %v599_v16, %v598_v14  ;;  %v1741_v14 = vpack.c.bf16 %v807_v7, %v806_v6  ;;  %v781_v16 = vld [vmem:[#allocation13 + $0xb8] sm:$0xff]  ;;  %v788_v7 = vld [vmem:[#allocation13 + $0xf0] sm:$0xff] }
 0x1cc   :  { %v320_v28 = vpop.f32.mrb[0].mxu0 }
 0x1cd   :  { %v321_v29 = vadd.f32 %v320_v28, %v247_v26  ;;  %v322_v30 = vpop.f32.mrb[1].mxu0  ;;  %v601_v26 = vld [vmem:[#allocation11 + $0x78] sm:$0xff]  ;;  %v1733_v28 = vpack.c.bf16 %v577_v18, %v576_v17  ;;  %v1743_v17 = vpack.c.bf16 %v825_v10, %v824_v9  ;;  %v808_v18 = vld [vmem:[#allocation14 + $0x20] sm:$0xff]  ;;  %v817_v10 = vld [vmem:[#allocation14 + $0x68] sm:$0xff] }
 0x1ce   :  { %v323_v31 = vadd.f32 %v322_v30, %v251_v27  ;;  %v774_v27 = vld [vmem:[#allocation13 + $0x80] sm:$0xff] }
 0x1cf   :  { %1867 = vtanh.f32 %v321_v29  ;;  %v775_v29 = vld [vmem:[#allocation13 + $0x88] sm:$0xff]  ;;  %v816_v9 = vld [vmem:[#allocation14 + $0x60] sm:$0xff] }
 0x1d0   :  { %1869 = vtanh.f32 %v323_v31  ;;  %v1767_v30 = vpack.c.bf16 %v775_v29, %v774_v27  ;;  %v1709_v31 = vpack.c.bf16 %v601_v26, %v600_v24  ;;  %v1777_v24 = vpack.c.bf16 %v763_v13, %v762_v12  ;;  %v827_v26 = vld [vmem:[#allocation14 + $0xb8] sm:$0xff]  ;;  %v834_v12 = vld [vmem:[#allocation14 + $0xf0] sm:$0xff] }
 0x1d1   :  { %v765_v29 = vld [vmem:[#allocation13 + $0x38] sm:$0xff] }
 0x1d2   :  { %v835_v13 = vld [vmem:[#allocation14 + $0xf8] sm:$0xff] }
 0x1d9   :  { %v2435_v39 = vpop.eup %1867 }
 0x1da   :  { %v2437_v41 = vpop.eup %1869  ;;  %v371_v46 = vmul.f32 %v2435_v39, %v364_v36 }
 0x1db   :  { %547 = vmatprep.mubr.f32.mxu0 %v2437_v41  ;;  %v372_v44 = vmul.f32 %v2437_v41, %v368_v35 }
 0x1dc   :  { %548 = vmatmul.mubr.f32.vlgmr.msra.gmra.mrb[2].mxu0 %v2435_v39 }
 0x1dd   :  { %469 = vmatprep.mubr.f32.mxu1 %v372_v44  ;;  %1713 = vmatpush3.bf16.msra.mxu0 %v1712_v40 }
 0x1de   :  { %470 = vmatmul.mubr.f32.vlgmr.msra.gmra.mrb[0].mxu1 %v371_v46  ;;  %1714 = vmatprep.subr.bf16.mxu0 %v2146_v20 }
 0x1df   :  { %1689 = vmatpush3.bf16.msra.mxu1 %v1688_v45  ;;  %1518 = vmatprep.mubr.msk.f32.mxu0 %vm2147_vm0, %v2145_v0  ;;  %v1234_v45 = vld [vmem:[%s2585_s30] ss:$0 sm:$0xff] }
 0x1e0   :  { %1690 = vmatprep.subr.bf16.mxu1 %v2146_v20  ;;  %1483 = vmatprep.mubr.msk.f32.mxu1 %vm2147_vm0, %v2145_v0 }
 0x1e1   :  { %1716 = vmatpush3.bf16.msra.mxu0 %v1715_v49  ;;  %v759_v49 = vld [vmem:[#allocation13 + $0x8] sm:$0xff] }
 0x1e2   :  { %1717 = vmatprep.subr.bf16.mxu0 %v2146_v20  ;;  %v1769_v55 = vpack.c.bf16 %v759_v49, %v758_v48  ;;  %v812_v48 = vld [vmem:[#allocation14 + $0x40] sm:$0xff]  ;;  %v813_v49 = vld [vmem:[#allocation14 + $0x48] sm:$0xff] }
 0x1e3   :  { %1692 = vmatpush3.bf16.msra.mxu1 %v1691_v52  ;;  %v777_v52 = vld [vmem:[#allocation13 + $0x98] sm:$0xff] }
 0x1e4   :  { %1693 = vmatprep.subr.bf16.mxu1 %v2146_v20  ;;  %v1771_v60 = vpack.c.bf16 %v777_v52, %v776_v51  ;;  %v830_v52 = vld [vmem:[#allocation14 + $0xd0] sm:$0xff] }
 0x1e5   :  { %1719 = vmatpush3.bf16.msra.mxu0 %v1718_v53  ;;  %v804_v53 = vld [vmem:[#allocation14] sm:$0xff] }
 0x1e6   :  { %1720 = vmatprep.subr.bf16.mxu0 %v2146_v20  ;;  %v1737_v1 = vpack.c.bf16 %v805_v54, %v804_v53  ;;  %v831_v53 = vld [vmem:[#allocation14 + $0xd8] sm:$0xff] }
 0x1e7   :  { %1695 = vmatpush3.bf16.msra.mxu1 %v1694_v56  ;;  %v1235_v56 = vld [vmem:[%s2548_s10] ss:$0 sm:$0xff] }
 0x1e8   :  { %1696 = vmatprep.subr.bf16.mxu1 %v2146_v20 }
 0x1e9   :  { %1722 = vmatpush3.bf16.msra.mxu0 %v1721_v59  ;;  %v823_v59 = vld [vmem:[#allocation14 + $0x98] sm:$0xff] }
 0x1ea   :  { %1723 = vmatprep.subr.bf16.mxu0 %v2146_v20 }
 0x1eb   :  { %1698 = vmatpush3.bf16.msra.mxu1 %v1697_v62  ;;  %v761_v62 = vld [vmem:[#allocation13 + $0x18] sm:$0xff] }
 0x1ec   :  { %1699 = vmatprep.subr.bf16.mxu1 %v2146_v20  ;;  %v1773_v25 = vpack.c.bf16 %v761_v62, %v760_v61  ;;  %v814_v61 = vld [vmem:[#allocation14 + $0x50] sm:$0xff]  ;;  %v815_v62 = vld [vmem:[#allocation14 + $0x58] sm:$0xff] }
 0x1ed   :  { %1725 = vmatpush3.bf16.msra.mxu0 %v1724_v2  ;;  %v778_v2 = vld [vmem:[#allocation13 + $0xa0] sm:$0xff]  ;;  %v1757_v6 = vpack.c.bf16 %v815_v62, %v814_v61  ;;  %v1027_v61 = vld [vmem:[#allocation17 + $0x50] sm:$0xff]  ;;  %v1028_v62 = vld [vmem:[#allocation17 + $0x58] sm:$0xff] }
 0x1ee   :  { %1726 = vmatprep.subr.bf16.mxu0 %v2146_v20 }
 0x1ef   :  { %1701 = vmatpush3.bf16.msra.mxu1 %v1700_v5  ;;  %v1739_v5 = vpack.c.bf16 %v823_v59, %v822_v58  ;;  %v786_v58 = vld [vmem:[#allocation13 + $0xe0] sm:$0xff]  ;;  %v787_v59 = vld [vmem:[#allocation13 + $0xe8] sm:$0xff] }
 0x1f0   :  { %1702 = vmatprep.subr.bf16.mxu1 %v2146_v20 }
 0x1f1   :  { %1728 = vmatpush3.bf16.msra.mxu0 %v1727_v8  ;;  %v803_v8 = vmul.f32 %v2437_v41, %v799_v57  ;;  %v1753_v57 = vpack.c.bf16 %v813_v49, %v812_v48  ;;  %v1023_v48 = vld [vmem:[#allocation17 + $0x30] sm:$0xff]  ;;  %v1024_v49 = vld [vmem:[#allocation17 + $0x38] sm:$0xff] }
 0x1f2   :  { %1729 = vmatprep.subr.bf16.mxu0 %v2146_v20 }
 0x1f3   :  { %1704 = vmatpush3.bf16.msra.mxu1 %v1703_v11  ;;  %v1775_v11 = vpack.c.bf16 %v779_v3, %v778_v2  ;;  %v833_v2 = vld [vmem:[#allocation14 + $0xe8] sm:$0xff]  ;;  %v1791_v3 = vpack.c.bf16 %v787_v59, %v786_v58  ;;  %v1003_v58 = vld [vmem:[#allocation16 + $0x50] sm:$0xff]  ;;  %v1004_v59 = vld [vmem:[#allocation16 + $0x58] sm:$0xff] }
 0x1f4   :  { %1705 = vmatprep.subr.bf16.mxu1 %v2146_v20 }
 0x1f5   :  { %1731 = vmatpush3.bf16.msra.mxu0 %v1730_v15  ;;  %v780_v15 = vld [vmem:[#allocation13 + $0xb0] sm:$0xff] }
 0x1f6   :  { %1732 = vmatprep.subr.bf16.mxu0 %v2146_v20  ;;  %v1779_v27 = vpack.c.bf16 %v781_v16, %v780_v15  ;;  %v772_v15 = vld [vmem:[#allocation13 + $0x70] sm:$0xff]  ;;  %v773_v16 = vld [vmem:[#allocation13 + $0x78] sm:$0xff] }
 0x1f7   :  { %1707 = vmatpush3.bf16.msra.mxu1 %v1706_v19  ;;  %v809_v19 = vld [vmem:[#allocation14 + $0x28] sm:$0xff] }
 0x1f8   :  { %1708 = vmatprep.subr.bf16.mxu1 %v2146_v20 }
 0x1f9   :  { %1734 = vmatpush3.bf16.msra.mxu0 %v1733_v28  ;;  %v764_v28 = vld [vmem:[#allocation13 + $0x30] sm:$0xff] }
 0x1fa   :  { %1768 = vmatprep.subr.bf16.mxu0 %v1767_v30  ;;  %v1745_v30 = vpack.c.bf16 %v809_v19, %v808_v18  ;;  %v1763_v18 = vpack.c.bf16 %v835_v13, %v834_v12  ;;  %v818_v19 = vld [vmem:[#allocation14 + $0x70] sm:$0xff]  ;;  %v1192_v12 = vand.u32 127, %v244_v21 }
 0x1fb   :  { %1710 = vmatpush3.bf16.msra.mxu1 %v1709_v31  ;;  %v782_v31 = vld [vmem:[#allocation13 + $0xc0] sm:$0xff] }
 0x1fc   :  { %1736 = vmatprep.subr.bf16.mxu1 %v1735_v34  ;;  %v810_v34 = vld [vmem:[#allocation14 + $0x30] sm:$0xff]  ;;  %vm1194_vm2 = vcmp.lt.s32.totalorder %v1192_v12, 6 }
 0x1fd   :  { %vm1195_vm3 = vmand %vm1193_vm1, %vm1194_vm2 }
 0x2af   :  { %v1310_v35 = vpop.f32.mrb[2].mxu0 }
 0x2b0   :  { %v1311_v36 = vpop.f32.mrb[3].mxu0 }
 0x2b1   :  { %v1312_v37 = vadd.f32 %v1311_v36, %v1310_v35  ;;  %v1275_v38 = vpop.f32.mrb[0].mxu1  ;;  %v811_v35 = vld [vmem:[#allocation14 + $0x38] sm:$0xff]  ;;  %v1781_v36 = vpack.c.bf16 %v765_v29, %v764_v28  ;;  %v993_v29 = vld [vmem:[#allocation16] sm:$0xff] }
 0x2b2   :  { %v1276_v40 = vpop.f32.mrb[1].mxu1 }
 0x2b3   :  { %v1277_v43 = vadd.f32 %v1276_v40, %v1275_v38  ;;  %v829_v38 = vld [vmem:[#allocation14 + $0xc8] sm:$0xff]  ;;  %v1783_v40 = vpack.c.bf16 %v783_v32, %v782_v31  ;;  %v995_v32 = vld [vmem:[#allocation16 + $0x10] sm:$0xff] }
 0x2b4   :  { %v1018_v31 = vld [vmem:[#allocation17 + $0x8] sm:$0xff] }
 0x2b5   :  { %v482_v44 = vmul.f32 %v1277_v43, %v1233_v42  ;;  %v766_v42 = vld [vmem:[#allocation13 + $0x40] sm:$0xff]  ;;  %v767_v43 = vld [vmem:[#allocation13 + $0x48] sm:$0xff] }
 0x2b6   :  { %v1785_v51 = vpack.c.bf16 %v767_v43, %v766_v42  ;;  %v1021_v42 = vld [vmem:[#allocation17 + $0x20] sm:$0xff]  ;;  %v1022_v43 = vld [vmem:[#allocation17 + $0x28] sm:$0xff] }
 0x2b7   :  { %v550_v46 = vadd.f32 %v1312_v37, %v482_v44  ;;  %v828_v37 = vld [vmem:[#allocation14 + $0xc0] sm:$0xff]  ;;  %v1749_v44 = vpack.c.bf16 %v811_v35, %v810_v34  ;;  %v1019_v35 = vld [vmem:[#allocation17 + $0x10] sm:$0xff] }
 0x2b9   :  { %v560_v47 = vadd.f32 %v1234_v45, %v550_v46  ;;  %v784_v45 = vld [vmem:[#allocation13 + $0xd0] sm:$0xff]  ;;  %v785_v46 = vld [vmem:[#allocation13 + $0xd8] sm:$0xff] }
 0x2ba   :  { %v1787_v54 = vpack.c.bf16 %v785_v46, %v784_v45  ;;  %v999_v45 = vld [vmem:[#allocation16 + $0x30] sm:$0xff]  ;;  %v1000_v46 = vld [vmem:[#allocation16 + $0x38] sm:$0xff] }
 0x2bb   :  { %1871 = vtanh.f32 %v560_v47  ;;  %v1751_v47 = vpack.c.bf16 %v829_v38, %v828_v37  ;;  %v998_v38 = vld [vmem:[#allocation16 + $0x28] sm:$0xff] }
 0x2c5   :  { %v1872_v63 = vpop.eup %1871 }
 0x2c6   :  { %1519 = vmatmul.mubr.f32.vlgmr.msra.gmra.mrb[4].mxu0 %v1872_v63  ;;  %v585_v4 = vmul.f32 %v1872_v63, %v1235_v56  ;;  %v769_v56 = vld [vmem:[#allocation13 + $0x58] sm:$0xff] }
 0x2c7   :  { %1770 = vmatpush3.bf16.msra.mxu0 %v1769_v55  ;;  %978 = vmatprep.mubr.f32.mxu0 %v2437_v41  ;;  %v826_v41 = vld [vmem:[#allocation14 + $0xb0] sm:$0xff] }
 0x2c8   :  { %1484 = vmatmul.mubr.f32.vlgmr.msra.gmra.mrb[2].mxu1 %v585_v4  ;;  %1772 = vmatprep.subr.bf16.mxu0 %v1771_v60  ;;  %v1747_v33 = vpack.c.bf16 %v827_v26, %v826_v41  ;;  %v768_v55 = vld [vmem:[#allocation13 + $0x50] sm:$0xff]  ;;  %v1755_v60 = vpack.c.bf16 %v831_v53, %v830_v52  ;;  %v770_v4 = vld [vmem:[#allocation13 + $0x60] sm:$0xff]  ;;  %v1797_v41 = vpack.c.bf16 %v773_v16, %v772_v15  ;;  %v1002_v53 = vld [vmem:[#allocation16 + $0x48] sm:$0xff] }
 0x2c9   :  { %1738 = vmatpush3.bf16.msra.mxu1 %v1737_v1  ;;  %900 = vmatprep.mubr.f32.mxu1 %v803_v8  ;;  %v1789_v63 = vpack.c.bf16 %v769_v56, %v768_v55  ;;  %v832_v1 = vld [vmem:[#allocation14 + $0xe0] sm:$0xff]  ;;  %v789_v8 = vld [vmem:[#allocation13 + $0xf8] sm:$0xff]  ;;  %v1026_v56 = vld [vmem:[#allocation17 + $0x48] sm:$0xff] }
 0x2ca   :  { %1740 = vmatprep.subr.bf16.mxu1 %v1739_v5  ;;  %v771_v5 = vld [vmem:[#allocation13 + $0x68] sm:$0xff]  ;;  %v1001_v52 = vld [vmem:[#allocation16 + $0x40] sm:$0xff] }
 0x2cb   :  { %1774 = vmatpush3.bf16.msra.mxu0 %v1773_v25  ;;  %v1759_v25 = vpack.c.bf16 %v833_v2, %v832_v1  ;;  %v1025_v55 = vld [vmem:[#allocation17 + $0x40] sm:$0xff]  ;;  %v1006_v2 = vld [vmem:[#allocation16 + $0x68] sm:$0xff] }
 0x2cc   :  { %1776 = vmatprep.subr.bf16.mxu0 %v1775_v11  ;;  %v1793_v11 = vpack.c.bf16 %v771_v5, %v770_v4  ;;  %v1005_v1 = vld [vmem:[#allocation16 + $0x60] sm:$0xff]  ;;  %v1030_v5 = vld [vmem:[#allocation17 + $0x68] sm:$0xff] }
 0x2cd   :  { %1742 = vmatpush3.bf16.msra.mxu1 %v1741_v14  ;;  %v1795_v14 = vpack.c.bf16 %v789_v8, %v788_v7  ;;  %v1842_v4 = vpack.c.bf16 %v1006_v2, %v1005_v1  ;;  %v1008_v7 = vld [vmem:[#allocation16 + $0x78] sm:$0xff] }
 0x2ce   :  { %1744 = vmatprep.subr.bf16.mxu1 %v1743_v17  ;;  %v1761_v17 = vpack.c.bf16 %v817_v10, %v816_v9  ;;  %v1032_v9 = vld [vmem:[#allocation17 + $0x78] sm:$0xff] }
 0x2cf   :  { %1778 = vmatpush3.bf16.msra.mxu0 %v1777_v24  ;;  %v819_v24 = vld [vmem:[#allocation14 + $0x78] sm:$0xff] }
 0x2d0   :  { %1780 = vmatprep.subr.bf16.mxu0 %v1779_v27  ;;  %v1765_v26 = vpack.c.bf16 %v819_v24, %v818_v19  ;;  %v795_v27 = vrot.slane %v2470_v50, %v2420_v23  ;;  %v994_v23 = vld [vmem:[#allocation16 + $0x8] sm:$0xff]  ;;  %v1017_v50 = vld [vmem:[#allocation17] sm:$0xff] }
 0x2d1   :  { %1746 = vmatpush3.bf16.msra.mxu1 %v1745_v30  ;;  %v1824_v30 = vpack.c.bf16 %v994_v23, %v993_v29  ;;  %v1800_v34 = vpack.c.bf16 %v1018_v31, %v1017_v50  ;;  %v1238_v23 = vld [vmem:[%s2554_s16] ss:$0 sm:$0xff] }
 0x2d2   :  { %1748 = vmatprep.subr.bf16.mxu1 %v1747_v33  ;;  %v802_v28 = vmul.f32 %v2435_v39, %v795_v27  ;;  %v996_v33 = vld [vmem:[#allocation16 + $0x18] sm:$0xff] }
 0x2d3   :  { %1782 = vmatpush3.bf16.msra.mxu0 %v1781_v36  ;;  %v1020_v36 = vld [vmem:[#allocation17 + $0x18] sm:$0xff] }
 0x2d4   :  { %1784 = vmatprep.subr.bf16.mxu0 %v1783_v40  ;;  %v1803_v37 = vpack.c.bf16 %v1020_v36, %v1019_v35 }
 0x2d5   :  { %1750 = vmatpush3.bf16.msra.mxu1 %v1749_v44  ;;  %v1806_v44 = vpack.c.bf16 %v1022_v43, %v1021_v42 }
 0x2d6   :  { %1752 = vmatprep.subr.bf16.mxu1 %v1751_v47  ;;  %v1833_v47 = vpack.c.bf16 %v1000_v46, %v999_v45 }
 0x2d7   :  { %1786 = vmatpush3.bf16.msra.mxu0 %v1785_v51  ;;  %v1809_v51 = vpack.c.bf16 %v1024_v49, %v1023_v48  ;;  %v1242_v49 = vld [vmem:[%s2587_s19] ss:$0 sm:$0xff] }
 0x2d8   :  { %1788 = vmatprep.subr.bf16.mxu0 %v1787_v54  ;;  %v1836_v54 = vpack.c.bf16 %v1002_v53, %v1001_v52 }
 0x2d9   :  { %1754 = vmatpush3.bf16.msra.mxu1 %v1753_v57  ;;  %v1812_v57 = vpack.c.bf16 %v1026_v56, %v1025_v55 }
 0x2da   :  { %1756 = vmatprep.subr.bf16.mxu1 %v1755_v60  ;;  %v1839_v60 = vpack.c.bf16 %v1004_v59, %v1003_v58 }
 0x2db   :  { %1790 = vmatpush3.bf16.msra.mxu0 %v1789_v63  ;;  %v1815_v63 = vpack.c.bf16 %v1028_v62, %v1027_v61 }
 0x2dc   :  { %1792 = vmatprep.subr.bf16.mxu0 %v1791_v3  ;;  %v1029_v3 = vld [vmem:[#allocation17 + $0x60] sm:$0xff] }
 0x2dd   :  { %1758 = vmatpush3.bf16.msra.mxu1 %v1757_v6  ;;  %v1007_v6 = vld [vmem:[#allocation16 + $0x70] sm:$0xff]  ;;  %v1818_v8 = vpack.c.bf16 %v1030_v5, %v1029_v3 }
 0x2de   :  { %1760 = vmatprep.subr.bf16.mxu1 %v1759_v25  ;;  %v1031_v25 = vld [vmem:[#allocation17 + $0x70] sm:$0xff]  ;;  %v1845_v10 = vpack.c.bf16 %v1008_v7, %v1007_v6 }
 0x2df   :  { %1794 = vmatpush3.bf16.msra.mxu0 %v1793_v11  ;;  %v1821_v11 = vpack.c.bf16 %v1032_v9, %v1031_v25 }
 0x2e0   :  { %1796 = vmatprep.subr.bf16.mxu0 %v1795_v14  ;;  %v1236_v14 = vld [vmem:[%s2549_s11] ss:$0 sm:$0xff] }
 0x2e1   :  { %1762 = vmatpush3.bf16.msra.mxu1 %v1761_v17 }
 0x2e2   :  { %1764 = vmatprep.subr.bf16.mxu1 %v1763_v18 }
 0x2e3   :  { %1798 = vmatpush3.bf16.msra.mxu0 %v1797_v41 }
 0x2e4   :  { %1823 = vmatprep.subr.bf16.mxu0 %v2146_v20 }
 0x2e5   :  { %1766 = vmatpush3.bf16.msra.mxu1 %v1765_v26 }
 0x2e6   :  { %979 = vmatmul.mubr.f32.vlgmr.msra.gmra.mrb[6].mxu0 %v2435_v39  ;;  %1799 = vmatprep.subr.bf16.mxu1 %v2146_v20  ;;  %v1827_v39 = vpack.c.bf16 %v996_v33, %v995_v32  ;;  %v1240_v33 = vld [vmem:[%s2558_s20] ss:$0 sm:$0xff] }
 0x2e7   :  { %1588 = vmatprep.mubr.msk.f32.mxu0 %vm2147_vm0, %v2145_v0  ;;  %1825 = vmatpush3.bf16.msra.mxu0 %v1824_v30  ;;  %v1239_v30 = vld [vmem:[%s2555_s17] ss:$0 sm:$0xff] }
 0x2e8   :  { %901 = vmatmul.mubr.f32.vlgmr.msra.gmra.mrb[4].mxu1 %v802_v28  ;;  %1826 = vmatprep.subr.bf16.mxu0 %v2146_v20 }
 0x2e9   :  { %1553 = vmatprep.mubr.msk.f32.mxu1 %vm2147_vm0, %v2145_v0  ;;  %1801 = vmatpush3.bf16.msra.mxu1 %v1800_v34  ;;  %v997_v0 = vld [vmem:[#allocation16 + $0x20] sm:$0xff] }
 0x2ea   :  { %1802 = vmatprep.subr.bf16.mxu1 %v2146_v20  ;;  %v1830_v40 = vpack.c.bf16 %v998_v38, %v997_v0 }
 0x2eb   :  { %1828 = vmatpush3.bf16.msra.mxu0 %v1827_v39 }
 0x2ec   :  { %1829 = vmatprep.subr.bf16.mxu0 %v2146_v20 }
 0x2ed   :  { %1804 = vmatpush3.bf16.msra.mxu1 %v1803_v37 }
 0x2ee   :  { %1805 = vmatprep.subr.bf16.mxu1 %v2146_v20 }
 0x2ef   :  { %1831 = vmatpush3.bf16.msra.mxu0 %v1830_v40 }
 0x2f0   :  { %1832 = vmatprep.subr.bf16.mxu0 %v2146_v20 }
 0x2f1   :  { %1807 = vmatpush3.bf16.msra.mxu1 %v1806_v44  ;;  %v1241_v44 = vld [vmem:[%s2586_s18] ss:$0 sm:$0xff] }
 0x2f2   :  { %1808 = vmatprep.subr.bf16.mxu1 %v2146_v20 }
 0x2f3   :  { %1834 = vmatpush3.bf16.msra.mxu0 %v1833_v47 }
 0x2f4   :  { %1835 = vmatprep.subr.bf16.mxu0 %v2146_v20 }
 0x2f5   :  { %1810 = vmatpush3.bf16.msra.mxu1 %v1809_v51 }
 0x2f6   :  { %1811 = vmatprep.subr.bf16.mxu1 %v2146_v20 }
 0x2f7   :  { %1837 = vmatpush3.bf16.msra.mxu0 %v1836_v54 }
 0x2f8   :  { %1838 = vmatprep.subr.bf16.mxu0 %v2146_v20 }
 0x2f9   :  { %1813 = vmatpush3.bf16.msra.mxu1 %v1812_v57 }
 0x2fa   :  { %1814 = vmatprep.subr.bf16.mxu1 %v2146_v20 }
 0x2fb   :  { %1840 = vmatpush3.bf16.msra.mxu0 %v1839_v60 }
 0x2fc   :  { %1841 = vmatprep.subr.bf16.mxu0 %v2146_v20 }
 0x2fd   :  { %1816 = vmatpush3.bf16.msra.mxu1 %v1815_v63 }
 0x2fe   :  { %1817 = vmatprep.subr.bf16.mxu1 %v2146_v20 }
 0x2ff   :  { %1843 = vmatpush3.bf16.msra.mxu0 %v1842_v4 }
 0x300   :  { %1844 = vmatprep.subr.bf16.mxu0 %v2146_v20 }
 0x301   :  { %1819 = vmatpush3.bf16.msra.mxu1 %v1818_v8 }
 0x302   :  { %1820 = vmatprep.subr.bf16.mxu1 %v2146_v20  ;;  %v1237_v20 = vld [vmem:[%s2550_s12] ss:$0 sm:$0xff] }
 0x303   :  { %1846 = vmatpush3.bf16.msra.mxu0 %v1845_v10 }
 0x305   :  { %1822 = vmatpush3.bf16.msra.mxu1 %v1821_v11 }
 0x399   :  { %v746_v13 = vpop.f32.mrb[4].mxu0 }
 0x39a   :  { %v1520_v15 = vpop.f32.mrb[5].mxu0 }
 0x39b   :  { %v668_v16 = vpop.f32.mrb[2].mxu1 }
 0x39c   :  { %v679_v17 = vmul.f32 %v1236_v14, %v668_v16  ;;  %v1485_v18 = vpop.f32.mrb[3].mxu1 }
 0x39e   :  { %v747_v19 = vadd.f32 %v746_v13, %v679_v17 }
 0x3a0   :  { %v757_v24 = vadd.f32 %v1237_v20, %v747_v19 }
 0x3a2   :  { %v1196_v21 = vsel %vm1195_vm3, %v757_v24, 0.0 }
 0x3a3   :  { %1197 = vadd.xlane.f32.xlu0 %v1196_v21 }
 0x3b9   :  { %v1414_v41 = vpop.f32.mrb[6].mxu0 }
 0x3ba   :  { %v1415_v26 = vpop.f32.mrb[7].mxu0 }
 0x3bb   :  { %v1416_v27 = vadd.f32 %v1415_v26, %v1414_v41  ;;  %v1379_v28 = vpop.f32.mrb[4].mxu1 }
 0x3bc   :  { %v1380_v29 = vpop.f32.mrb[5].mxu1 }
 0x3bd   :  { %v1381_v22 = vadd.f32 %v1380_v29, %v1379_v28 }
 0x3bf   :  { %v913_v50 = vmul.f32 %v1381_v22, %v1238_v23 }
 0x3c1   :  { %v981_v31 = vadd.f32 %v1416_v27, %v913_v50 }
 0x3c3   :  { %v991_v32 = vadd.f32 %v1239_v30, %v981_v31 }
 0x3c5   :  { %1873 = vtanh.f32 %v991_v32 }
 0x3cf   :  { %v1874_v34 = vpop.eup %1873 }
 0x3d0   :  { %1589 = vmatmul.mubr.f32.vlgmr.msra.gmra.mrb[8].mxu0 %v1874_v34  ;;  %v1016_v35 = vmul.f32 %v1874_v34, %v1240_v33 }
 0x3d2   :  { %1554 = vmatmul.mubr.f32.vlgmr.msra.gmra.mrb[6].mxu1 %v1016_v35 }
 0x430   :  { %v1198_v36 = vpop.xlane.xlu0 %1197 }
 0x431   :  { %v1199_v39 = vrot.slane %v1198_v36, 4 }
 0x433   :  { %v1200_v37 = vadd.f32 %v1199_v39, %v1198_v36 }
 0x435   :  { %v1201_v0 = vrot.slane %v1200_v37, 2 }
 0x437   :  { %v1202_v38 = vadd.f32 %v1201_v0, %v1200_v37 }
 0x439   :  { %v1203_v40 = vrot.slane %v1202_v38, 1 }
 0x43b   :  { %v1204_v42 = vadd.f32 %v1203_v40, %v1202_v38 }
 0x43d   :  { %1847 = vpush %v1204_v42 }
 0x46e   :  { %s1848_s5 = spop %1847 }
 0x46f   :  { %s1206_s28 = smul.f32 0.041666668, %s1848_s5 }
 0x471   :  { %v1210_v55 = vstv %s1206_s28 }
 0x4a3   :  { %v1177_v43 = vpop.f32.mrb[8].mxu0 }
 0x4a4   :  { %v1590_v45 = vpop.f32.mrb[9].mxu0 }
 0x4a5   :  { %v1099_v46 = vpop.f32.mrb[6].mxu1 }
 0x4a6   :  { %v1110_v47 = vmul.f32 %v1241_v44, %v1099_v46  ;;  %v1555_v48 = vpop.f32.mrb[7].mxu1 }
 0x4a8   :  { %v1178_v51 = vadd.f32 %v1177_v43, %v1110_v47 }
 0x4aa   :  { %v1188_v52 = vadd.f32 %v1242_v49, %v1178_v51 }
 0x4ac   :  { %1207 = vadd.xlane.f32.xlu0 %v1188_v52 }
 0x539   :  { %v1208_v53 = vpop.xlane.xlu0 %1207 }
 0x53a   :  { %v1209_v54 = vadd.f32 %v1208_v53, %v757_v24 }
 0x53c   :  { %v1211_v56 = vsub.f32 %v1209_v54, %v1210_v55 }
 0x53e   :  { %1212 = vst [vmem:[#allocation19] sm:$0xff] %v1211_v56 }
 0x53f   :  { %2106 = shalt.err (!%p2103_p0)
}
 0x540   :  { %s2588_s29 = sld [smem:[#allocation37_spill]] }
 0x546   :  { %s2107_s23 = scalar_lea.hbm %s2588_s29, 128 }
 0x547   :  { %p2108_p1 = scmp.ne.s32.totalorder %s2588_s29, %s2107_s23  ;;  %p2111_p2 = scmp.lt.u32.totalorder %s2107_s23, %s2588_s29 }
 0x549   :  { %p2113_p3 = pnand %p2111_p2, %p2108_p1 }
 0x54b   :  { %2116 = shalt.err (!%p2113_p3)
}
 0x54c   :  { %1222 = dma.vmem_to_hbm [thread:$0]  %s1220_s24, 128, %s2588_s29, [#allocation4]  }
 0x54d   :  { %2129 = dma.done.wait [#allocation4], 128  }
 0x54e   :  { %2130 = vsyncadd [#allocation4], 4294967168 }
 0x54f   :  { %1226 = vsyncpa [#allocation3], 1 }
 0x550   :  { %1227 = vsyncpa [#allocation6], 1 }
 0x551   :  { %1228 = vsyncpa [#allocation9], 1 }
 0x552   :  { %1229 = vsyncpa [#allocation12], 1 }
 0x553   :  { %1230 = vsyncpa [#allocation15], 1 }
 0x554   :  { %1231 = vsyncpa [#allocation18], 1 }
 0x555   :  { %1232 = vsyncpa [#allocation4], 1 }

</bundles_post_ra>
